<compile_context>
chip_gen: v7x
topology: tpu7x:2x2x1
jax: 0.10.0
libtpu: 0.0.40
codegen_flags: <defaults>
</compile_context>

<pallas_src>
import jax
import jax.numpy as jnp
from jax import lax
from jax.experimental import pallas as pl
from jax.experimental.pallas import tpu as pltpu

MAX_CONF = 0.99
MIN_CONF = 0.9
MARGIN = 0.3
TAG = "max"  # 'max' or 'margin', as in Tco.__init__

LANES = 128  # TPU lane width


def _round_up(x, m):
    return ((x + m - 1) // m) * m


def _make_scoring_kernel(tag, max_conf, min_conf, margin):
    """Pseudo-label scoring kernel: K-tiled matmul + softmax/argmax epilogue."""
    thresh = (max_conf + min_conf) / 2.0

    def kernel(feat_ref, wt_ref, alloc_ref, bias_ref, label_ref,
               probs_ref, packed_ref, acc_ref):
        k = pl.program_id(1)

        # ---- K-tiled logits accumulation: feats(bf16) @ W^T(bf16) -> f32 ----
        @pl.when(k == 0)
        def _():
            acc_ref[...] = jnp.zeros_like(acc_ref)

        acc_ref[...] += jnp.dot(feat_ref[...], wt_ref[...],
                                preferred_element_type=jnp.float32)

        # ---- epilogue on the last K step: softmax / argmax / selection ----
        @pl.when(k == pl.num_programs(1) - 1)
        def _():
            logits = acc_ref[...]                                   # (BM, Cp) f32
            cp = logits.shape[1]
            # alloc re-weighting + hide padded classes (bias = 0 or -inf).
            scaled = logits * alloc_ref[...] + bias_ref[...]

            m = jnp.max(scaled, axis=1, keepdims=True)              # (BM, 1)
            e = jnp.exp(scaled - m)
            denom = jnp.sum(e, axis=1, keepdims=True)
            inv = pl.reciprocal(denom, approx=False)                # EUP; exact for parity
            probs = e * inv
            probs_ref[...] = probs.astype(probs_ref.dtype)          # lane-dense store

            # argmax (first occurrence) on pre-softmax reweighted logits.
            ids = lax.broadcasted_iota(jnp.int32, scaled.shape, 1)
            pred = jnp.min(jnp.where(scaled == m, ids, cp), axis=1, keepdims=True)
            max_p = inv                                             # == max(probs): exp(0)*inv

            if tag == "margin":
                second_p = jnp.max(jnp.where(ids == pred, -jnp.inf, probs),
                                   axis=1, keepdims=True)
                cond = (max_p - second_p) > margin
            else:  # 'max'
                cond = max_p > thresh
            cond_i = cond.astype(jnp.int32)
            corr_i = cond_i * (pred == label_ref[...]).astype(jnp.int32)

            # pack pred / selected / correct into one lane-dense int32 slab.
            lane = lax.broadcasted_iota(jnp.int32, packed_ref.shape, 1)
            packed = jnp.where(lane == 0, pred,
                     jnp.where(lane == 1, cond_i,
                     jnp.where(lane == 2, corr_i, 0)))
            packed_ref[...] = packed

    return kernel


def tco_scoring(feats, weight, allocated, labels, *,
                block_b=128, block_k=2048, tag=TAG,
                max_conf=MAX_CONF, min_conf=MIN_CONF, margin=MARGIN,
                probs_dtype=jnp.float32):
    """Fused Tco.select scoring.

    feats:     (B, D) f32 flattened images
    weight:    (C, D) f32 fc.weight
    allocated: (C,)   f32 per-class allocation counts
    labels:    (B,)   int32 ground-truth labels

    Returns (conf[C], probs[B,C], pred[B,1], selected[B,1], correct[B,1]).

    block_b: batch tile (128 fits v5e's 4x128 MXU; use 256 on v6e/v7x when the
    VMEM budget allows).  block_k: K-reduction tile (multiple of 128).
    probs_dtype: set to jnp.bfloat16 to halve the probs HBM writeback if exact
    probabilities are not needed downstream.
    """
    feats = jnp.asarray(feats, jnp.float32)
    weight = jnp.asarray(weight, jnp.float32)
    B, D = feats.shape
    C = weight.shape[0]

    Cp = _round_up(max(C, LANES), LANES)          # lane-dense class axis
    Bp = _round_up(max(B, block_b), block_b)      # MXU-sized batch tiles
    G = Bp // block_b
    tk = min(_round_up(D, LANES), _round_up(block_k, LANES))   # K tile (mult. of 128)
    Dp = _round_up(D, tk)
    KT = Dp // tk

    # ---- batch-invariant math hoisted to the wrapper (plain JAX, once) ----
    # Per-class confidence thresholds from ||W_c||_2 (f32 weight).
    value = jnp.sqrt(jnp.sum(weight * weight, axis=1))          # (C,)
    vmin = jnp.min(value)
    vmax = jnp.max(value)
    den = vmax - vmin
    safe_den = jnp.where(den > 0.0, den, 1.0)                   # guard all-equal norms
    conf = min_conf + (value - vmin) / safe_den * (max_conf - min_conf)

    # Allocation scale + padded-class bias (0 valid lanes, -inf padding).
    alloc = jnp.asarray(allocated, jnp.float32).reshape(C)
    amax = jnp.max(alloc)
    safe_amax = jnp.where(amax != 0.0, amax, 1.0)               # guard max(allocated)==0
    alloc_scale = jnp.zeros((1, Cp), jnp.float32).at[0, :C].set(alloc / safe_amax)
    bias = jnp.full((1, Cp), -jnp.inf, jnp.float32).at[0, :C].set(0.0)

    # Pad / cast once (W^T reused every batch -> amortized; bf16 halves VMEM/HBM).
    feats_p = jnp.zeros((Bp, Dp), jnp.bfloat16).at[:B, :D].set(feats.astype(jnp.bfloat16))
    wt = jnp.zeros((Dp, Cp), jnp.bfloat16).at[:D, :C].set(weight.T.astype(jnp.bfloat16))
    labels_p = jnp.full((Bp, 1), -1, jnp.int32).at[:B, 0].set(
        jnp.asarray(labels, jnp.int32).reshape(B))

    kernel = _make_scoring_kernel(tag, max_conf, min_conf, margin)

    # Explicit VMEM budget: 2x feats tile (bf16), W tile(s) (bf16, single-buffered
    # when fully resident), f32 logits accumulator, double-buffered outputs.
    probs_bytes = jnp.dtype(probs_dtype).itemsize
    est = (2 * block_b * tk * 2
           + (1 if KT == 1 else 2) * tk * Cp * 2
           + block_b * Cp * 4
           + 2 * block_b * Cp * probs_bytes
           + 2 * block_b * LANES * 4
           + 4 * Cp * 4 + 4 * block_b * 4)
    vmem_limit = int(min(96 << 20, max(16 << 20, 2 * est)))

    # W^T: single-buffer when it is resident (block index never changes).
    if KT == 1:
        wt_spec = pl.BlockSpec((tk, Cp), lambda i, k: (k, 0),
                               pipeline_mode=pl.Buffered(1))
    else:
        wt_spec = pl.BlockSpec((tk, Cp), lambda i, k: (k, 0))
    # TODO(synk): if a profile shows exposed feats DMA, bump the feats spec to
    # pipeline_mode=pl.Buffered(3) where the per-generation VMEM budget allows.

    probs_p, packed = pl.pallas_call(
        kernel,
        out_shape=(
            jax.ShapeDtypeStruct((Bp, Cp), probs_dtype),      # softmax probs
            jax.ShapeDtypeStruct((Bp, LANES), jnp.int32),     # packed pred/sel/corr
        ),
        grid=(G, KT),
        in_specs=[
            pl.BlockSpec((block_b, tk), lambda i, k: (i, k)),          # feats (bf16)
            wt_spec,                                                    # W^T (bf16)
            pl.BlockSpec((1, Cp), lambda i, k: (0, 0),
                         pipeline_mode=pl.Buffered(1)),                 # alloc scale
            pl.BlockSpec((1, Cp), lambda i, k: (0, 0),
                         pipeline_mode=pl.Buffered(1)),                 # pad bias
            pl.BlockSpec((block_b, 1), lambda i, k: (i, 0)),            # labels
        ],
        out_specs=(
            pl.BlockSpec((block_b, Cp), lambda i, k: (i, 0)),
            pl.BlockSpec((block_b, LANES), lambda i, k: (i, 0)),
        ),
        scratch_shapes=[pltpu.VMEM((block_b, Cp), jnp.float32)],        # logits acc
        compiler_params=pltpu.CompilerParams(
            dimension_semantics=("parallel", "arbitrary"),
            vmem_limit_bytes=vmem_limit),
    )(feats_p, wt, alloc_scale, bias, labels_p)

    probs = probs_p[:B, :C]
    pred = packed[:B, 0:1]
    selected = packed[:B, 1:2]
    correct = packed[:B, 2:3]
    return conf, probs, pred, selected, correct


# TODO(synk): the Adam optimizer step, cross-entropy backward, and the
# tqdm/dataloader training loop of Tco.forward have no Pallas equivalent; the
# data-dependent torch.cat of selected images is returned as a per-image
# selection mask instead.


if __name__ == "__main__":
    key = jax.random.PRNGKey(0)
    k_img, k_w, k_lbl = jax.random.split(key, 3)

    B, CH, H, W = 8, 4, 16, 16          # images, NCHW like PyTorch
    NUM_CLASSES = 8
    D = CH * H * W                      # flattened feature dim = 1024

    imgs = jax.random.normal(k_img, (B, CH, H, W), dtype=jnp.float32)
    feats = imgs.reshape(B, D)                                   # glue reshape
    fc_weight = jax.random.normal(k_w, (NUM_CLASSES, D), dtype=jnp.float32) * 0.05
    labels = jax.random.randint(k_lbl, (B,), 0, NUM_CLASSES, dtype=jnp.int32)
    allocated = jnp.arange(1, NUM_CLASSES + 1, dtype=jnp.float32)

    # block_k=256 so the K-reduction grid axis (KT=4) is actually exercised.
    conf, probs, pred, selected, correct = tco_scoring(
        feats, fc_weight, allocated, labels, block_k=256)

    # Plain-JAX bookkeeping mirroring Tco.select outputs.
    n_selected = jnp.sum(selected)
    er = n_selected >= 2                                    # 'er' flag
    sum_label = jnp.sum(correct)                            # right pseudo labels
    corrects_per_class = jnp.zeros((NUM_CLASSES,), jnp.int32).at[
        pred[:, 0]].add(correct[:, 0])

    jax.block_until_ready((conf, probs, pred, selected, correct,
                           n_selected, er, sum_label, corrects_per_class))
    print("KERNEL_OK")
</pallas_src>

<mosaic_0001>
module attributes {stable_mosaic.version = 11 : i64} {
  func.func @kernel(%arg0: i32, %arg1: i32, %arg2: memref<128x256xbf16, #tpu.memory_space<vmem>>, %arg3: memref<256x128xbf16, #tpu.memory_space<vmem>>, %arg4: memref<1x128xf32, #tpu.memory_space<vmem>>, %arg5: memref<1x128xf32, #tpu.memory_space<vmem>>, %arg6: memref<128x1xi32, #tpu.memory_space<vmem>>, %arg7: memref<128x128xf32, #tpu.memory_space<vmem>>, %arg8: memref<128x128xi32, #tpu.memory_space<vmem>>, %arg9: memref<128x128xf32, #tpu.memory_space<vmem>>) attributes {dimension_semantics = [#tpu.dimension_semantics<parallel>, #tpu.dimension_semantics<arbitrary>], iteration_bounds = array<i64: 1, 4>, scalar_prefetch = 0 : i64, scratch_operands = 1 : i64, tpu.core_type = #tpu.core_type<tc>, window_params = [{transform_indices = @transform_0, window_bounds = array<i64: 128, 256>}, {transform_indices = @transform_1, window_bounds = array<i64: 256, 128>}, {pipeline_mode = #tpu.pipeline_mode<synchronous>, transform_indices = @transform_2, window_bounds = array<i64: 1, 128>}, {pipeline_mode = #tpu.pipeline_mode<synchronous>, transform_indices = @transform_3, window_bounds = array<i64: 1, 128>}, {transform_indices = @transform_4, window_bounds = array<i64: 128, 1>}, {transform_indices = @transform_5, window_bounds = array<i64: 128, 128>}, {transform_indices = @transform_6, window_bounds = array<i64: 128, 128>}]} {
    %c0_i32 = arith.constant 0 : i32
    %0 = arith.cmpi eq, %arg1, %c0_i32 : i32
    %1 = arith.extui %0 : i1 to i32
    %c0_i32_0 = arith.constant 0 : i32
    %2 = arith.cmpi ne, %1, %c0_i32_0 : i32
    scf.if %2 {
      %cst_9 = arith.constant 0.000000e+00 : f32
      %12 = vector.broadcast %cst_9 : f32 to vector<128x128xf32>
      %c0_10 = arith.constant 0 : index
      %c0_11 = arith.constant 0 : index
      %13 = vector.load %arg9[%c0_10, %c0_11] : memref<128x128xf32, #tpu.memory_space<vmem>>, vector<128x128xf32>
      tpu.vector_store %arg9[%c0_10, %c0_11], %12 {strides = array<i32>} : memref<128x128xf32, #tpu.memory_space<vmem>>, vector<128x128xf32>,
    } else {
    }
    %c0 = arith.constant 0 : index
    %c0_1 = arith.constant 0 : index
    %3 = vector.load %arg9[%c0, %c0_1] : memref<128x128xf32, #tpu.memory_space<vmem>>, vector<128x128xf32>
    %c0_2 = arith.constant 0 : index
    %c0_3 = arith.constant 0 : index
    %4 = vector.load %arg2[%c0_2, %c0_3] : memref<128x256xbf16, #tpu.memory_space<vmem>>, vector<128x256xbf16>
    %c0_4 = arith.constant 0 : index
    %c0_5 = arith.constant 0 : index
    %5 = vector.load %arg3[%c0_4, %c0_5] : memref<256x128xbf16, #tpu.memory_space<vmem>>, vector<256x128xbf16>
    %cst = arith.constant dense<0.000000e+00> : vector<128x128xf32>
    %6 = tpu.matmul %4, %5, %cst {dimension_numbers = #tpu.dot_dimension_numbers<[1], [0], [0], [1], [0, 0, 1, 1], [], []>} : vector<128x256xbf16>, vector<256x128xbf16>, vector<128x128xf32> -> vector<128x128xf32>
    %7 = arith.addf %3, %6 : vector<128x128xf32>
    %c0_6 = arith.constant 0 : index
    %c0_7 = arith.constant 0 : index
    %8 = vector.load %arg9[%c0_6, %c0_7] : memref<128x128xf32, #tpu.memory_space<vmem>>, vector<128x128xf32>
    tpu.vector_store %arg9[%c0_6, %c0_7], %7 {strides = array<i32>} : memref<128x128xf32, #tpu.memory_space<vmem>>, vector<128x128xf32>,
    %c3_i32 = arith.constant 3 : i32
    %9 = arith.cmpi eq, %arg1, %c3_i32 : i32
    %10 = arith.extui %9 : i1 to i32
    %c0_i32_8 = arith.constant 0 : i32
    %11 = arith.cmpi ne, %10, %c0_i32_8 : i32
    scf.if %11 {
      %c0_9 = arith.constant 0 : index
      %c0_10 = arith.constant 0 : index
      %12 = vector.load %arg9[%c0_9, %c0_10] : memref<128x128xf32, #tpu.memory_space<vmem>>, vector<128x128xf32>
      %c0_11 = arith.constant 0 : index
      %c0_12 = arith.constant 0 : index
      %13 = vector.load %arg4[%c0_11, %c0_12] : memref<1x128xf32, #tpu.memory_space<vmem>>, vector<1x128xf32>
      %14 = vector.broadcast %13 : vector<1x128xf32> to vector<128x128xf32>
      %15 = arith.mulf %12, %14 : vector<128x128xf32>
      %c0_13 = arith.constant 0 : index
      %c0_14 = arith.constant 0 : index
      %16 = vector.load %arg5[%c0_13, %c0_14] : memref<1x128xf32, #tpu.memory_space<vmem>>, vector<1x128xf32>
      %17 = vector.broadcast %16 : vector<1x128xf32> to vector<128x128xf32>
      %18 = arith.addf %15, %17 : vector<128x128xf32>
      %cst_15 = arith.constant dense<0xFF800000> : vector<128xf32>
      %19 = vector.multi_reduction <maximumf>, %18, %cst_15 [1] : vector<128x128xf32> to vector<128xf32>
      %20 = vector.shape_cast %19 : vector<128xf32> to vector<128x1xf32>
      %21 = vector.broadcast %20 : vector<128x1xf32> to vector<128x128xf32>
      %22 = arith.subf %18, %21 : vector<128x128xf32>
      %23 = math.exp %22 : vector<128x128xf32>
      %cst_16 = arith.constant dense<0.000000e+00> : vector<128xf32>
      %24 = vector.multi_reduction <add>, %23, %cst_16 [1] : vector<128x128xf32> to vector<128xf32>
      %25 = vector.shape_cast %24 : vector<128xf32> to vector<128x1xf32>
      %26 = tpu.reciprocal %25 : vector<128x1xf32> -> vector<128x1xf32>
      %27 = vector.broadcast %26 : vector<128x1xf32> to vector<128x128xf32>
      %28 = arith.mulf %23, %27 : vector<128x128xf32>
      %c0_17 = arith.constant 0 : index
      %c0_18 = arith.constant 0 : index
      %29 = vector.load %arg7[%c0_17, %c0_18] : memref<128x128xf32, #tpu.memory_space<vmem>>, vector<128x128xf32>
      tpu.vector_store %arg7[%c0_17, %c0_18], %28 {strides = array<i32>} : memref<128x128xf32, #tpu.memory_space<vmem>>, vector<128x128xf32>,
      %30 = tpu.iota {dimensions = array<i32: 1>} : vector<128x128xi32>
      %31 = vector.broadcast %20 : vector<128x1xf32> to vector<128x128xf32>
      %32 = arith.cmpf oeq, %18, %31 : vector<128x128xf32>
      %c128_i32 = arith.constant 128 : i32
      %33 = vector.broadcast %c128_i32 : i32 to vector<128x128xi32>
      %34 = arith.select %32, %30, %33 : vector<128x128xi1>, vector<128x128xi32>
      %cst_19 = arith.constant dense<2147483647> : vector<128xi32>
      %35 = vector.multi_reduction <minsi>, %34, %cst_19 [1] : vector<128x128xi32> to vector<128xi32>
      %36 = vector.shape_cast %35 : vector<128xi32> to vector<128x1xi32>
      %cst_20 = arith.constant 0.944999992 : f32
      %37 = vector.broadcast %cst_20 : f32 to vector<128x1xf32>
      %38 = arith.cmpf ogt, %26, %37 : vector<128x1xf32>
      %39 = arith.extui %38 : vector<128x1xi1> to vector<128x1xi32>
      %c0_21 = arith.constant 0 : index
      %c0_22 = arith.constant 0 : index
      %40 = vector.load %arg6[%c0_21, %c0_22] : memref<128x1xi32, #tpu.memory_space<vmem>>, vector<128x1xi32>
      %41 = arith.cmpi eq, %36, %40 : vector<128x1xi32>
      %42 = arith.extui %41 : vector<128x1xi1> to vector<128x1xi32>
      %43 = arith.muli %39, %42 : vector<128x1xi32>
      %44 = tpu.iota {dimensions = array<i32: 1>} : vector<128x128xi32>
      %c0_i32_23 = arith.constant 0 : i32
      %45 = vector.broadcast %c0_i32_23 : i32 to vector<128x128xi32>
      %46 = arith.cmpi eq, %44, %45 : vector<128x128xi32>
      %c1_i32 = arith.constant 1 : i32
      %47 = vector.broadcast %c1_i32 : i32 to vector<128x128xi32>
      %48 = arith.cmpi eq, %44, %47 : vector<128x128xi32>
      %c2_i32 = arith.constant 2 : i32
      %49 = vector.broadcast %c2_i32 : i32 to vector<128x128xi32>
      %50 = arith.cmpi eq, %44, %49 : vector<128x128xi32>
      %c0_i32_24 = arith.constant 0 : i32
      %51 = vector.shape_cast %43 : vector<128x1xi32> to vector<128x1xi32>
      %52 = vector.broadcast %51 : vector<128x1xi32> to vector<128x128xi32>
      %53 = vector.broadcast %c0_i32_24 : i32 to vector<128x128xi32>
      %54 = arith.select %50, %52, %53 : vector<128x128xi1>, vector<128x128xi32>
      %55 = vector.shape_cast %39 : vector<128x1xi32> to vector<128x1xi32>
      %56 = vector.broadcast %55 : vector<128x1xi32> to vector<128x128xi32>
      %57 = arith.select %48, %56, %54 : vector<128x128xi1>, vector<128x128xi32>
      %58 = vector.shape_cast %36 : vector<128x1xi32> to vector<128x1xi32>
      %59 = vector.broadcast %58 : vector<128x1xi32> to vector<128x128xi32>
      %60 = arith.select %46, %59, %57 : vector<128x128xi1>, vector<128x128xi32>
      %c0_25 = arith.constant 0 : index
      %c0_26 = arith.constant 0 : index
      %61 = vector.load %arg8[%c0_25, %c0_26] : memref<128x128xi32, #tpu.memory_space<vmem>>, vector<128x128xi32>
      tpu.vector_store %arg8[%c0_25, %c0_26], %60 {strides = array<i32>} : memref<128x128xi32, #tpu.memory_space<vmem>>, vector<128x128xi32>,
    } else {
    }
    return
  }
  func.func @transform_0(%arg0: i32, %arg1: i32) -> (i32, i32) {
    %c0_i32 = arith.constant 0 : i32
    return %arg0, %arg1 : i32, i32
  }
  func.func @transform_1(%arg0: i32, %arg1: i32) -> (i32, i32) {
    %c0_i32 = arith.constant 0 : i32
    %c0_i32_0 = arith.constant 0 : i32
    return %arg1, %c0_i32 : i32, i32
  }
  func.func @transform_2(%arg0: i32, %arg1: i32) -> (i32, i32) {
    %c0_i32 = arith.constant 0 : i32
    %c0_i32_0 = arith.constant 0 : i32
    %c0_i32_1 = arith.constant 0 : i32
    return %c0_i32, %c0_i32_0 : i32, i32
  }
  func.func @transform_3(%arg0: i32, %arg1: i32) -> (i32, i32) {
    %c0_i32 = arith.constant 0 : i32
    %c0_i32_0 = arith.constant 0 : i32
    %c0_i32_1 = arith.constant 0 : i32
    return %c0_i32, %c0_i32_0 : i32, i32
  }
  func.func @transform_4(%arg0: i32, %arg1: i32) -> (i32, i32) {
    %c0_i32 = arith.constant 0 : i32
    %c0_i32_0 = arith.constant 0 : i32
    return %arg0, %c0_i32 : i32, i32
  }
  func.func @transform_5(%arg0: i32, %arg1: i32) -> (i32, i32) {
    %c0_i32 = arith.constant 0 : i32
    %c0_i32_0 = arith.constant 0 : i32
    return %arg0, %c0_i32 : i32, i32
  }
  func.func @transform_6(%arg0: i32, %arg1: i32) -> (i32, i32) {
    %c0_i32 = arith.constant 0 : i32
    %c0_i32_0 = arith.constant 0 : i32
    return %arg0, %c0_i32 : i32, i32
  }
}

</mosaic_0001>

<bundles_post_ra>
// kernel: tpu_custom_call.1
= control target key start
LH: loop header
LB: loop body
LE: loop exit
PB: predicated region body
PF: predicated region fallthrough
CT: control target
= control target key end

     0   :  { %12 = vsyncpa [#allocation4], 0  ;;  %s3207_s0 = inlined_call_operand.hbm [shape: bf16[128,1024], index: 0, kind: input, shape index: {}]   ;;  %s3208_s1 = inlined_call_operand.hbm [shape: bf16[1024,128], index: 1, kind: input, shape index: {}]   ;;  %s3209_s2 = inlined_call_operand.vmem [shape: f32[1,128], index: 2, kind: input, shape index: {}]   ;;  %s3210_s3 = inlined_call_operand.vmem [shape: f32[1,128], index: 3, kind: input, shape index: {}]   ;;  %s3211_s4 = inlined_call_operand.vmem [shape: s32[128,1], index: 4, kind: input, shape index: {}]   ;;  %s3212_s5 = inlined_call_operand.hbm [shape: f32[128,128], index: 5, kind: output, shape index: {0}]   ;;  %s3213_s6 = inlined_call_operand.hbm [shape: s32[128,128], index: 6, kind: output, shape index: {1}]  }
   0x1   :  { %14 = vsyncpa [#allocation4 + $0x1], 0 }
   0x2   :  { %15 = vsyncpa [#allocation7], 0 }
   0x3   :  { %17 = vsyncpa [#allocation7 + $0x1], 0 }
   0x4   :  { %18 = vsyncpa [#allocation5], 0 }
   0x5   :  { %19 = vsyncpa [#allocation10], 0  ;;  %s2129_s21 = smov 0   ;;  %s2131_s22 = smov 0  }
   0x6   :  { %s2133_s23 = smov 0   ;;  %s2135_s24 = smov 0  }
   0x7   :  { %s2137_s25 = smov 0   ;;  %s2139_s26 = smov 0  }
   0x8 LB: > { %s3214_s27 = sadd.s32 4294967295, %s2079_s26   ;;  %s34_s28 = sadd.s32 1, %s2075_s25  ;;  %s2079_s26 = sphi %s2139_s26, %s25_s26   ;;  %s2075_s25 = sphi %s2137_s25, %s3228_s25   ;;  %s2071_s24 = sphi %s2135_s24, %s3227_s24   ;;  %s2067_s23 = sphi %s2133_s23, %s3226_s23   ;;  %s2063_s22 = sphi %s2131_s22, %s3225_s22   ;;  %s2059_s21 = sphi %s2129_s21, %s3224_s21  }
   0x9   : > { %p35_p0 = scmp.ge.s32.totalorder %s34_s28, 4  ;;  %s46_s29 = sadd.s32 1, %s2067_s23 }
   0xa   : > { %p53_p1 = scmp.ne.s32.totalorder %s2067_s23, %s2063_s22  ;;  %p54_p2 = scmp.eq.s32.totalorder %s2079_s26, 0 }
   0xb   : > { %s3230_s28 = smov (%p35_p0, %s34_s28), 0  ;;  %p59_p4 = scmp.ne.s32.totalorder %s2063_s22, %s2059_s21 }
   0xc   : > { %p2165_p3 = por %p54_p2, %p53_p1  ;;  %s42_s7 = ssub.s32 %s2075_s25, %s3230_s28 }
   0xd   : > { %p60_p5 = scmp.eq.s32.totalorder %s3214_s27, 0  ;;  %p44_p6 = scmp.eq.s32.totalorder %s42_s7, 0 }
   0xe   : > { %p1735_p8 = scmp.lt.s32.totalorder %s2079_s26, 4  ;;  %s2183_s10 = sand.u32 1, %s2067_s23  }
   0xf   : > { %p2174_p7 = por %p60_p5, %p59_p4  ;;  %s1634_s11 = sshll.u32 %s2075_s25, 7 }
  0x10   : > { %s2180_s9 = scalar_select %p44_p6, %s2067_s23, %s46_s29  }
  0x11   : > { %s3217_s8 = scalar_select %p2174_p7, 1, 0 }
  0x12   : > { %s1583_s12 = sshll.u32 %s2183_s10, 7  ;;  %s2190_s15 = scalar_lea.hbm %s3207_s0, %s1634_s11 }
  0x13   : > { %s248_s16 = scalar_lea.vmem [#allocation3], %s1583_s12  ;;  %p2196_p9 = pnand %p1735_p8, %p2165_p3 }
  0x14   : > { %s258_s17 = sshll.u32 %s248_s16, 4  ;;  %s245_s19 = scalar_lea.sflag [#allocation4], %s2183_s10  ;;  %s2200_s17 = int_to_ptr.vmem [resolvable:$true] %s258_s17 }
  0x15   : > { %s1905_s20 = scalar_lea.hbm %s2190_s15, 2048  ;;  %p1907_p12 = pneg %p2196_p9 }
  0x16   : > { %p1906_p11 = scmp.ne.s32.totalorder %s2190_s15, %s1905_s20  ;;  %s1910_s30 = scalar_lea.hbm %s3207_s0, 8192 }
  0x17   : > { %p1911_p1 = scmp.lt.u32.totalorder %s2190_s15, %s3207_s0  ;;  %p1912_p2 = scmp.lt.u32.totalorder %s1910_s30, %s1905_s20 }
  0x18   : > { %p1908_p13 = pnand %p1907_p12, %p1906_p11  ;;  %p1914_p4 = scmp.lt.u32.totalorder %s1905_s20, %s2190_s15 }
  0x19   : > { %p1913_p3 = por %p1912_p2, %p1911_p1 }
  0x1a   : > { %p1909_p0 = pneg %p1908_p13 }
  0x1b   : > { %p1915_p5 = por %p1914_p4, %p1913_p3 }
  0x1d   : > { %p1916_p6 = pnand %p1915_p5, %p1909_p0 }
  0x1f   : > { %1919 = shalt.err (!%p1916_p6)
}
  0x20   : > { %s1920_s13 = scalar_lea.vmem %s2200_s17, 2048  ;;  %s2081_s14 = smov [#allocation3]  }
  0x21   : > { %p1921_p8 = scmp.ne.s32.totalorder %s2200_s17, %s1920_s13  ;;  %s1925_s16 = sshll.u32 %s2081_s14, 4  ;;  %s1926_s16 = int_to_ptr.vmem [resolvable:$false] %s1925_s16 }
  0x22   : > { %s1927_s21 = scalar_lea.vmem %s1926_s16, 4096  ;;  %p1928_p10 = scmp.lt.s32.totalorder %s2200_s17, %s1926_s16 }
  0x23   : > { %p1923_p11 = pnand %p1921_p8, %p1907_p12  ;;  %p1929_p1 = scmp.lt.s32.totalorder %s1927_s21, %s1920_s13 }
  0x25   : > { %p1924_p13 = pneg %p1923_p11  ;;  %p1930_p2 = por %p1929_p1, %p1928_p10 }
  0x27   : > { %p1931_p3 = pnand %p1930_p2, %p1924_p13 }
  0x29   : > { %1934 = shalt.err (!%p1931_p3)
}
  0x2a   : > { %s2082_s20 = smov 512   ;;  %s2083_s29 = smov 128  }
  0x2b   : > { %s2084_s30 = smov 8   ;;  %p287_p0 = scmp.lt.s32.totalorder %s2079_s26, 5 }
  0x2c   : > { %1731 = dma.hbm_to_vmem [thread:$0]  (!%p2196_p9), %s2190_s15, 2048, %s2200_s17, %s245_s19, %s2082_s20, %s2083_s29, %s2084_s30  }
  0x2d   : > { %s1635_s7 = sshll.u32 %s2075_s25, 11  ;;  %p3219_p10 = scmp.ge.s32.totalorder %s2079_s26, 1 }
  0x2e   : > { %s2242_s16 = scalar_lea.hbm %s3208_s1, %s1635_s7  ;;  %s272_s21 = scalar_lea.vmem [#allocation6], %s1583_s12 }
  0x2f   : > { %p2235_p4 = pnand %p3219_p10, %p287_p0  ;;  %s279_s27 = sshll.u32 %s272_s21, 4  ;;  %s2246_s27 = int_to_ptr.vmem [resolvable:$true] %s279_s27 }
  0x30   : > { %s269_s15 = scalar_lea.sflag [#allocation7], %s2183_s10  ;;  %s1935_s17 = scalar_lea.hbm %s2242_s16, 2048 }
  0x31   : > { %p1936_p5 = scmp.ne.s32.totalorder %s2242_s16, %s1935_s17  ;;  %s1940_s29 = scalar_lea.hbm %s3208_s1, 8192 }
  0x32   : > { %p1941_p11 = scmp.lt.u32.totalorder %s2242_s16, %s3208_s1  ;;  %p1942_p13 = scmp.lt.u32.totalorder %s1940_s29, %s1935_s17 }
  0x33   : > { %p1938_p6 = pnand %p1936_p5, %p1907_p12  ;;  %p1944_p2 = scmp.lt.u32.totalorder %s1935_s17, %s2242_s16 }
  0x34   : > { %p1943_p1 = por %p1942_p13, %p1941_p11 }
  0x35   : > { %p1939_p8 = pneg %p1938_p6 }
  0x36   : > { %p1945_p3 = por %p1944_p2, %p1943_p1 }
  0x38   : > { %p1946_p0 = pnand %p1945_p3, %p1939_p8 }
  0x3a   : > { %1949 = shalt.err (!%p1946_p0)
}
  0x3b   : > { %s1950_s12 = scalar_lea.vmem %s2246_s27, 2048  ;;  %s2085_s13 = smov [#allocation6]  }
  0x3c   : > { %p1951_p10 = scmp.ne.s32.totalorder %s2246_s27, %s1950_s12  ;;  %s1955_s14 = sshll.u32 %s2085_s13, 4  ;;  %s1956_s14 = int_to_ptr.vmem [resolvable:$false] %s1955_s14 }
  0x3d   : > { %s1957_s21 = scalar_lea.vmem %s1956_s14, 4096  ;;  %p1958_p7 = scmp.lt.s32.totalorder %s2246_s27, %s1956_s14 }
  0x3e   : > { %p1953_p5 = pnand %p1951_p10, %p1907_p12  ;;  %p1959_p11 = scmp.lt.s32.totalorder %s1957_s21, %s1950_s12 }
  0x40   : > { %p1954_p6 = pneg %p1953_p5  ;;  %p1960_p13 = por %p1959_p11, %p1958_p7 }
  0x42   : > { %p1961_p1 = pnand %p1960_p13, %p1954_p6 }
  0x44   : > { %1964 = shalt.err (!%p1961_p1)
}
  0x45   : > { %s2086_s17 = smov 64   ;;  %s2087_s19 = smov 4  }
  0x46   : > { %1734 = dma.hbm_to_vmem [thread:$0]  (!%p2196_p9), %s2242_s16, 2048, %s2246_s27, %s269_s15, %s2086_s17, %s2086_s17, %s2087_s19  }
  0x47   : > { %291 = sbr.rel (%p2235_p4) target bundleno = 1025 (0x401), region = 40  ;;  %s293_s20 = sand.u32 (!%p2235_p4), 1, %s2063_s22  }
  0x48   : > { %s1590_s29 = sshll.u32 (!%p2235_p4), %s293_s20, 7  ;;  %s294_s30 = scalar_lea.sflag (!%p2235_p4), [#allocation4], %s293_s20 }
  0x49   : > { %s2277_s7 = scalar_lea.vmem (!%p2235_p4), [#allocation3], %s1590_s29  ;;  %p3221_p7 = scmp.ne.s32.totalorder (!%p2235_p4), %s3217_s8, 0 }
  0x4e   : > { %2042 = dma.done.wait (%p3221_p7), %s294_s30, 2048  }
  0x4f   : > { %2044 = vsyncadd (%p3221_p7), %s294_s30, 4294965248  ;;  %s303_s12 = scalar_lea.sflag [#allocation7], %s293_s20  ;;  %s2283_s18 = scalar_lea.vmem [#allocation6], %s1590_s29 }
  0x50   : > { %2046 = dma.done.wait (%p3221_p7), %s303_s12, 2048  }
  0x51   : > { %2048 = vsyncadd (%p3221_p7), %s303_s12, 4294965248  ;;  %p1592_p9 = scmp.ne.s32.totalorder %s2071_s24, 0 }
  0x52   : > { %v2088_v0 = vmov (!%p1592_p9), 0.0  }
  0x53   : > { %355 = sbr.rel (%p1592_p9) target bundleno = 91 (0x5b), region = 52  ;;  %356 = vst [vmem:[#allocation2] sm:$0xff] (!%p1592_p9), %v2088_v0  ;;  %357 = vst [vmem:[#allocation2 + $0x8] sm:$0xff] (!%p1592_p9), %v2088_v0 }
  0x54   : > { %358 = vst [vmem:[#allocation2 + $0x10] sm:$0xff] (!%p1592_p9), %v2088_v0  ;;  %359 = vst [vmem:[#allocation2 + $0x18] sm:$0xff] (!%p1592_p9), %v2088_v0 }
  0x55   : > { %360 = vst [vmem:[#allocation2 + $0x20] sm:$0xff] (!%p1592_p9), %v2088_v0  ;;  %361 = vst [vmem:[#allocation2 + $0x28] sm:$0xff] (!%p1592_p9), %v2088_v0 }
  0x56   : > { %362 = vst [vmem:[#allocation2 + $0x30] sm:$0xff] (!%p1592_p9), %v2088_v0  ;;  %363 = vst [vmem:[#allocation2 + $0x38] sm:$0xff] (!%p1592_p9), %v2088_v0 }
  0x57   : > { %364 = vst [vmem:[#allocation2 + $0x40] sm:$0xff] (!%p1592_p9), %v2088_v0  ;;  %365 = vst [vmem:[#allocation2 + $0x48] sm:$0xff] (!%p1592_p9), %v2088_v0 }
  0x58   : > { %366 = vst [vmem:[#allocation2 + $0x50] sm:$0xff] (!%p1592_p9), %v2088_v0  ;;  %367 = vst [vmem:[#allocation2 + $0x58] sm:$0xff] (!%p1592_p9), %v2088_v0 }
  0x59   : > { %368 = vst [vmem:[#allocation2 + $0x60] sm:$0xff] (!%p1592_p9), %v2088_v0  ;;  %369 = vst [vmem:[#allocation2 + $0x68] sm:$0xff] (!%p1592_p9), %v2088_v0 }
  0x5a   : > { %370 = vst [vmem:[#allocation2 + $0x70] sm:$0xff] %v2088_v0  ;;  %371 = vst [vmem:[#allocation2 + $0x78] sm:$0xff] %v2088_v0 }
  0x5b PF: > { %v1799_v1 = vld [vmem:[%s2283_s18 + $0x40] sm:$0xff]   ;;  %v1801_v3 = vld [vmem:[%s2283_s18 + $0x48] sm:$0xff]   ;;  %v1803_v5 = vld [vmem:[%s2283_s18 + $0x50] sm:$0xff]   ;;  %p1625_p12 = scmp.ne.s32.totalorder %s2071_s24, 3 }
  0x5c   : > { %v1800_v2 = vld [vmem:[%s2283_s18] sm:$0xff]   ;;  %1636 = vmatprep.subr.bf16.mxu0 %v1799_v1  ;;  %1700 = vmatprep.subr.bf16.mxu1 %v1799_v1  ;;  %v1802_v4 = vld [vmem:[%s2283_s18 + $0x8] sm:$0xff]   ;;  %v1804_v6 = vld [vmem:[%s2283_s18 + $0x10] sm:$0xff]  }
  0x5d   : > { %1637 = vmatpush3.bf16.msra.mxu0 %v1800_v2  ;;  %1708 = vmatpush3.bf16.msra.mxu1 %v1800_v2  ;;  %v1805_v7 = vld [vmem:[%s2283_s18 + $0x58] sm:$0xff]   ;;  %v1807_v9 = vld [vmem:[%s2283_s18 + $0x60] sm:$0xff]   ;;  %v1809_v11 = vld [vmem:[%s2283_s18 + $0x68] sm:$0xff]  }
  0x5e   : > { %1638 = vmatprep.subr.bf16.mxu0 %v1801_v3  ;;  %1701 = vmatprep.subr.bf16.mxu1 %v1801_v3  ;;  %v1806_v8 = vld [vmem:[%s2283_s18 + $0x18] sm:$0xff]   ;;  %v1808_v10 = vld [vmem:[%s2283_s18 + $0x20] sm:$0xff]   ;;  %v1810_v14 = vld [vmem:[%s2283_s18 + $0x28] sm:$0xff]  }
  0x5f   : > { %v1817_v12 = vld [vmem:[%s2277_s7 + $0x4] ss:$8 sps:$4 sm:$0xff]   ;;  %v1811_v15 = vld [vmem:[%s2283_s18 + $0x70] sm:$0xff]   ;;  %v1813_v17 = vld [vmem:[%s2283_s18 + $0x78] sm:$0xff]  }
  0x60   : > { %v1820_v13 = vld [vmem:[%s2277_s7 + $0x44] ss:$8 sps:$4 sm:$0xff]   ;;  %644 = vmatprep.mubr.bf16.mxu0 %v1817_v12  ;;  %v1812_v16 = vld [vmem:[%s2283_s18 + $0x30] sm:$0xff]   ;;  %v1814_v18 = vld [vmem:[%s2283_s18 + $0x38] sm:$0xff]  }
  0x61   : > { %1639 = vmatpush3.bf16.msra.mxu0 %v1802_v4  ;;  %1709 = vmatpush3.bf16.msra.mxu1 %v1802_v4  ;;  %v1815_v19 = vld [vmem:[%s2277_s7] ss:$8 sps:$4 sm:$0xff]   ;;  %v1821_v21 = vld [vmem:[%s2277_s7 + $0x14] ss:$8 sps:$4 sm:$0xff]   ;;  %v1825_v23 = vld [vmem:[%s2277_s7 + $0x10] ss:$8 sps:$4 sm:$0xff]  }
  0x62   : > { %1640 = vmatprep.subr.bf16.mxu0 %v1803_v5  ;;  %1702 = vmatprep.subr.bf16.mxu1 %v1803_v5  ;;  %v1818_v20 = vld [vmem:[%s2277_s7 + $0x40] ss:$8 sps:$4 sm:$0xff]   ;;  %v1823_v22 = vld [vmem:[%s2277_s7 + $0x54] ss:$8 sps:$4 sm:$0xff]   ;;  %v1826_v24 = vld [vmem:[%s2277_s7 + $0x50] ss:$8 sps:$4 sm:$0xff]  }
  0x63   : > { %676 = vmatprep.mubr.bf16.mxu1 %v1820_v13  ;;  %v1827_v25 = vld [vmem:[%s2277_s7 + $0x24] ss:$8 sps:$4 sm:$0xff]   ;;  %v1831_v27 = vld [vmem:[%s2277_s7 + $0x20] ss:$8 sps:$4 sm:$0xff]   ;;  %v1833_v29 = vld [vmem:[%s2277_s7 + $0x34] ss:$8 sps:$4 sm:$0xff]  }
  0x64   : > { %v1829_v26 = vld [vmem:[%s2277_s7 + $0x64] ss:$8 sps:$4 sm:$0xff]   ;;  %v1832_v28 = vld [vmem:[%s2277_s7 + $0x60] ss:$8 sps:$4 sm:$0xff]   ;;  %v1835_v30 = vld [vmem:[%s2277_s7 + $0x74] ss:$8 sps:$4 sm:$0xff]  }
  0x65   : > { %1641 = vmatpush3.bf16.msra.mxu0 %v1804_v6  ;;  %1710 = vmatpush3.bf16.msra.mxu1 %v1804_v6  ;;  %v1837_v31 = vld [vmem:[%s2277_s7 + $0x30] ss:$8 sps:$4 sm:$0xff]   ;;  %v372_v35 = vld [vmem:[#allocation2] sm:$0xff]  ;;  %v373_v43 = vld [vmem:[#allocation2 + $0x8] sm:$0xff] }
  0x66   : > { %1642 = vmatprep.subr.bf16.mxu0 %v1805_v7  ;;  %1703 = vmatprep.subr.bf16.mxu1 %v1805_v7  ;;  %v1838_v32 = vld [vmem:[%s2277_s7 + $0x70] ss:$8 sps:$4 sm:$0xff]   ;;  %v380_v37 = vld [vmem:[#allocation2 + $0x40] sm:$0xff]  ;;  %v381_v45 = vld [vmem:[#allocation2 + $0x48] sm:$0xff] }
  0x67   : > { %v374_v55 = vld [vmem:[#allocation2 + $0x10] sm:$0xff]  ;;  %v375_v63 = vld [vmem:[#allocation2 + $0x18] sm:$0xff]  ;;  %v384_v13 = vld [vmem:[#allocation2 + $0x60] sm:$0xff] }
  0x68   : > { %v382_v57 = vld [vmem:[#allocation2 + $0x50] sm:$0xff]  ;;  %v383_v1 = vld [vmem:[#allocation2 + $0x58] sm:$0xff] }
  0x69   : > { %1643 = vmatpush3.bf16.msra.mxu0 %v1806_v8  ;;  %1711 = vmatpush3.bf16.msra.mxu1 %v1806_v8 }
  0x6a   : > { %1644 = vmatprep.subr.bf16.mxu0 %v1807_v9  ;;  %1704 = vmatprep.subr.bf16.mxu1 %v1807_v9 }
  0x6d   : > { %1645 = vmatpush3.bf16.msra.mxu0 %v1808_v10  ;;  %1712 = vmatpush3.bf16.msra.mxu1 %v1808_v10 }
  0x6e   : > { %1646 = vmatprep.subr.bf16.mxu0 %v1809_v11  ;;  %1705 = vmatprep.subr.bf16.mxu1 %v1809_v11  ;;  %v376_v11 = vld [vmem:[#allocation2 + $0x20] sm:$0xff] }
  0x71   : > { %1647 = vmatpush3.bf16.msra.mxu0 %v1810_v14  ;;  %1713 = vmatpush3.bf16.msra.mxu1 %v1810_v14 }
  0x72   : > { %1648 = vmatprep.subr.bf16.mxu0 %v1811_v15  ;;  %1706 = vmatprep.subr.bf16.mxu1 %v1811_v15 }
  0x75   : > { %1649 = vmatpush3.bf16.msra.mxu0 %v1812_v16  ;;  %1714 = vmatpush3.bf16.msra.mxu1 %v1812_v16 }
  0x76   : > { %1650 = vmatprep.subr.bf16.mxu0 %v1813_v17  ;;  %1707 = vmatprep.subr.bf16.mxu1 %v1813_v17 }
  0x79   : > { %1651 = vmatpush3.bf16.msra.mxu0 %v1814_v18  ;;  %1715 = vmatpush3.bf16.msra.mxu1 %v1814_v18 }
  0x7c   : > { %645 = vmatmul.mubr.bf16.vlgmr.msra.gmra.mrb[0].mxu0 %v1815_v19  ;;  %677 = vmatmul.mubr.bf16.vlgmr.msra.gmra.mrb[0].mxu1 %v1818_v20  ;;  %v377_v19 = vld [vmem:[#allocation2 + $0x28] sm:$0xff] }
  0x7d   : > { %652 = vmatprep.mubr.bf16.mxu0 %v1821_v21  ;;  %684 = vmatprep.mubr.bf16.mxu1 %v1823_v22  ;;  %v385_v21 = vld [vmem:[#allocation2 + $0x68] sm:$0xff] }
  0x84   : > { %653 = vmatmul.mubr.bf16.gmra.mrb[4].mxu0 %v1825_v23  ;;  %685 = vmatmul.mubr.bf16.gmra.mrb[4].mxu1 %v1826_v24 }
  0x85   : > { %660 = vmatprep.mubr.bf16.mxu0 %v1827_v25  ;;  %692 = vmatprep.mubr.bf16.mxu1 %v1829_v26 }
  0x8c   : > { %661 = vmatmul.mubr.bf16.gmra.mrb[8].mxu0 %v1831_v27  ;;  %693 = vmatmul.mubr.bf16.gmra.mrb[8].mxu1 %v1832_v28 }
  0x8d   : > { %668 = vmatprep.mubr.bf16.mxu0 %v1833_v29  ;;  %700 = vmatprep.mubr.bf16.mxu1 %v1835_v30 }
  0x94   : > { %669 = vmatmul.mubr.bf16.gmra.mrb[12].mxu0 %v1837_v31  ;;  %701 = vmatmul.mubr.bf16.gmra.mrb[12].mxu1 %v1838_v32  ;;  %v378_v31 = vld [vmem:[#allocation2 + $0x30] sm:$0xff] }
 0x14f   : > { %v1652_v33 = vpop.f32.mrb[0].mxu0  ;;  %v1676_v34 = vpop.f32.mrb[0].mxu1 }
 0x150   : > { %v1653_v36 = vpop.f32.mrb[1].mxu0  ;;  %v1677_v38 = vpop.f32.mrb[1].mxu1 }
 0x151   : > { %v1654_v39 = vadd.f32 %v1653_v36, %v1652_v33  ;;  %v1678_v40 = vadd.f32 %v1677_v38, %v1676_v34  ;;  %v1655_v41 = vpop.f32.mrb[2].mxu0  ;;  %v1679_v42 = vpop.f32.mrb[2].mxu1  ;;  %v386_v33 = vld [vmem:[#allocation2 + $0x70] sm:$0xff] }
 0x152   : > { %v1656_v44 = vpop.f32.mrb[3].mxu0  ;;  %v1680_v46 = vpop.f32.mrb[3].mxu1 }
 0x153   : > { %v709_v47 = vadd.f32 %v1654_v39, %v372_v35  ;;  %v717_v48 = vadd.f32 %v1678_v40, %v380_v37  ;;  %v1657_v49 = vadd.f32 %v1656_v44, %v1655_v41  ;;  %v1681_v50 = vadd.f32 %v1680_v46, %v1679_v42  ;;  %v379_v39 = vld [vmem:[#allocation2 + $0x38] sm:$0xff] }
 0x154   : > { %v387_v41 = vld [vmem:[#allocation2 + $0x78] sm:$0xff] }
 0x155   : > { %725 = vst [vmem:[#allocation2] sm:$0xff] %v709_v47  ;;  %733 = vst [vmem:[#allocation2 + $0x40] sm:$0xff] %v717_v48  ;;  %v710_v51 = vadd.f32 %v1657_v49, %v373_v43  ;;  %v718_v52 = vadd.f32 %v1681_v50, %v381_v45  ;;  %v1626_v50 = vld [vmem:[%s3209_s2] ss:$0 sm:$0xff] (!%p1625_p12) }
 0x157   : > { %726 = vst [vmem:[#allocation2 + $0x8] sm:$0xff] %v710_v51  ;;  %734 = vst [vmem:[#allocation2 + $0x48] sm:$0xff] %v718_v52  ;;  %v1658_v53 = vpop.f32.mrb[4].mxu0  ;;  %v1682_v54 = vpop.f32.mrb[4].mxu1  ;;  %v1627_v51 = vld [vmem:[%s3210_s3] ss:$0 sm:$0xff] (!%p1625_p12) }
 0x158   : > { %v1659_v56 = vpop.f32.mrb[5].mxu0  ;;  %v1683_v58 = vpop.f32.mrb[5].mxu1 }
 0x159   : > { %v1660_v59 = vadd.f32 %v1659_v56, %v1658_v53  ;;  %v1684_v60 = vadd.f32 %v1683_v58, %v1682_v54  ;;  %v1661_v61 = vpop.f32.mrb[6].mxu0  ;;  %v1685_v62 = vpop.f32.mrb[6].mxu1 }
 0x15a   : > { %v1662_v0 = vpop.f32.mrb[7].mxu0  ;;  %v1686_v2 = vpop.f32.mrb[7].mxu1 }
 0x15b   : > { %v711_v3 = vadd.f32 %v1660_v59, %v374_v55  ;;  %v719_v4 = vadd.f32 %v1684_v60, %v382_v57  ;;  %v1663_v5 = vadd.f32 %v1662_v0, %v1661_v61  ;;  %v1687_v6 = vadd.f32 %v1686_v2, %v1685_v62 }
 0x15c   : > { %v745_v49 = vld [vmem:[#allocation2] sm:$0xff] (!%p1625_p12) }
 0x15d   : > { %727 = vst [vmem:[#allocation2 + $0x10] sm:$0xff] %v711_v3  ;;  %735 = vst [vmem:[#allocation2 + $0x50] sm:$0xff] %v719_v4  ;;  %v712_v7 = vadd.f32 %v1663_v5, %v375_v63  ;;  %v720_v8 = vadd.f32 %v1687_v6, %v383_v1  ;;  %v768_v52 = vmul.f32 (!%p1625_p12), %v1626_v50, %v745_v49 }
 0x15e   : > { %v746_v54 = vld [vmem:[#allocation2 + $0x8] sm:$0xff] (!%p1625_p12) }
 0x15f   : > { %728 = vst [vmem:[#allocation2 + $0x18] sm:$0xff] %v712_v7  ;;  %736 = vst [vmem:[#allocation2 + $0x58] sm:$0xff] %v720_v8  ;;  %v1664_v9 = vpop.f32.mrb[8].mxu0  ;;  %v1688_v10 = vpop.f32.mrb[8].mxu1  ;;  %v769_v57 = vmul.f32 (!%p1625_p12), %v1626_v50, %v746_v54  ;;  %v2329_v60 = vadd.f32 (!%p1625_p12), %v1627_v51, %v768_v52 }
 0x160   : > { %v1665_v12 = vpop.f32.mrb[9].mxu0  ;;  %v1689_v14 = vpop.f32.mrb[9].mxu1 }
 0x161   : > { %v1666_v15 = vadd.f32 %v1665_v12, %v1664_v9  ;;  %v1690_v16 = vadd.f32 %v1689_v14, %v1688_v10  ;;  %v1667_v17 = vpop.f32.mrb[10].mxu0  ;;  %v1691_v18 = vpop.f32.mrb[10].mxu1  ;;  %807 = vmax.xlane.f32.xlu0 (!%p1625_p12), %v2329_v60  ;;  %v2334_v63 = vadd.f32 (!%p1625_p12), %v1627_v51, %v769_v57  ;;  %v753_v9 = vld [vmem:[#allocation2 + $0x40] sm:$0xff] (!%p1625_p12)  ;;  %v754_v10 = vld [vmem:[#allocation2 + $0x48] sm:$0xff] (!%p1625_p12) }
 0x162   : > { %v1668_v20 = vpop.f32.mrb[11].mxu0  ;;  %v1692_v22 = vpop.f32.mrb[11].mxu1  ;;  %v776_v12 = vmul.f32 (!%p1625_p12), %v1626_v50, %v753_v9  ;;  %v777_v14 = vmul.f32 (!%p1625_p12), %v1626_v50, %v754_v10 }
 0x163   : > { %v713_v23 = vadd.f32 %v1666_v15, %v376_v11  ;;  %v721_v24 = vadd.f32 %v1690_v16, %v384_v13  ;;  %v1669_v25 = vadd.f32 %v1668_v20, %v1667_v17  ;;  %v1693_v26 = vadd.f32 %v1692_v22, %v1691_v18 }
 0x164   : > { %v747_v53 = vld [vmem:[#allocation2 + $0x10] sm:$0xff] (!%p1625_p12)  ;;  %v2352_v17 = vadd.f32 (!%p1625_p12), %v1627_v51, %v776_v12 }
 0x165   : > { %729 = vst [vmem:[#allocation2 + $0x20] sm:$0xff] %v713_v23  ;;  %737 = vst [vmem:[#allocation2 + $0x60] sm:$0xff] %v721_v24  ;;  %v714_v27 = vadd.f32 %v1669_v25, %v377_v19  ;;  %v722_v28 = vadd.f32 %v1693_v26, %v385_v21  ;;  %v770_v56 = vmul.f32 (!%p1625_p12), %v1626_v50, %v747_v53  ;;  %809 = vmax.xlane.f32.xlu0 (!%p1625_p12), %v2334_v63  ;;  %v755_v15 = vld [vmem:[#allocation2 + $0x50] sm:$0xff] (!%p1625_p12) }
 0x166   : > { %v748_v55 = vld [vmem:[#allocation2 + $0x18] sm:$0xff] (!%p1625_p12)  ;;  %v778_v18 = vmul.f32 (!%p1625_p12), %v1626_v50, %v755_v15  ;;  %v2355_v19 = vadd.f32 (!%p1625_p12), %v1627_v51, %v777_v14 }
 0x167   : > { %730 = vst [vmem:[#allocation2 + $0x28] sm:$0xff] %v714_v27  ;;  %738 = vst [vmem:[#allocation2 + $0x68] sm:$0xff] %v722_v28  ;;  %v1670_v29 = vpop.f32.mrb[12].mxu0  ;;  %v1694_v30 = vpop.f32.mrb[12].mxu1  ;;  %v771_v58 = vmul.f32 (!%p1625_p12), %v1626_v50, %v748_v55  ;;  %v2331_v62 = vadd.f32 (!%p1625_p12), %v1627_v51, %v770_v56  ;;  %v756_v16 = vld [vmem:[#allocation2 + $0x58] sm:$0xff] (!%p1625_p12) }
 0x168   : > { %v1671_v32 = vpop.f32.mrb[13].mxu0  ;;  %v1695_v34 = vpop.f32.mrb[13].mxu1  ;;  %v779_v20 = vmul.f32 (!%p1625_p12), %v1626_v50, %v756_v16  ;;  %v2358_v23 = vadd.f32 (!%p1625_p12), %v1627_v51, %v778_v18 }
 0x169   : > { %v1672_v35 = vadd.f32 %v1671_v32, %v1670_v29  ;;  %v1696_v36 = vadd.f32 %v1695_v34, %v1694_v30  ;;  %v1673_v37 = vpop.f32.mrb[14].mxu0  ;;  %v1697_v38 = vpop.f32.mrb[14].mxu1  ;;  %744 = sbr.rel (%p1625_p12) target bundleno = 974 (0x3ce), region = 56  ;;  %811 = vmax.xlane.f32.xlu1 (!%p1625_p12), %v2331_v62  ;;  %v2337_v1 = vadd.f32 (!%p1625_p12), %v1627_v51, %v771_v58 }
 0x16a   : > { %v1674_v40 = vpop.f32.mrb[15].mxu0  ;;  %v1698_v42 = vpop.f32.mrb[15].mxu1  ;;  %v2361_v25 = vadd.f32 (!%p1625_p12), %v1627_v51, %v779_v20 }
 0x16b   : > { %v715_v43 = vadd.f32 %v1672_v35, %v378_v31  ;;  %v723_v44 = vadd.f32 %v1696_v36, %v386_v33  ;;  %v1675_v45 = vadd.f32 %v1674_v40, %v1673_v37  ;;  %v1699_v46 = vadd.f32 %v1698_v42, %v1697_v38 }
 0x16c   : > { %v749_v59 = vld [vmem:[#allocation2 + $0x20] sm:$0xff] (!%p1625_p12)  ;;  %v967_v35 = vlaneseq (!%p1625_p12) }
 0x16d   : > { %731 = vst [vmem:[#allocation2 + $0x30] sm:$0xff] %v715_v43  ;;  %739 = vst [vmem:[#allocation2 + $0x70] sm:$0xff] %v723_v44  ;;  %v716_v47 = vadd.f32 %v1675_v45, %v379_v39  ;;  %v724_v48 = vadd.f32 %v1699_v46, %v387_v41  ;;  %v772_v0 = vmul.f32 (!%p1625_p12), %v1626_v50, %v749_v59  ;;  %813 = vmax.xlane.f32.xlu1 (!%p1625_p12), %v2337_v1  ;;  %v757_v21 = vld [vmem:[#allocation2 + $0x60] sm:$0xff] (!%p1625_p12) }
 0x16e   : > { %v750_v61 = vld [vmem:[#allocation2 + $0x28] sm:$0xff] (!%p1625_p12)  ;;  %v780_v24 = vmul.f32 (!%p1625_p12), %v1626_v50, %v757_v21  ;;  %v2377_v36 = vand.u32 (!%p1625_p12), 127, %v967_v35 }
 0x16f   : > { %732 = vst [vmem:[#allocation2 + $0x38] sm:$0xff] %v716_v47  ;;  %740 = vst [vmem:[#allocation2 + $0x78] sm:$0xff] %v724_v48  ;;  %v773_v2 = vmul.f32 (!%p1625_p12), %v1626_v50, %v750_v61  ;;  %v2340_v5 = vadd.f32 (!%p1625_p12), %v1627_v51, %v772_v0  ;;  %v758_v22 = vld [vmem:[#allocation2 + $0x68] sm:$0xff] (!%p1625_p12) }
 0x170   : > { %v781_v26 = vmul.f32 %v1626_v50, %v758_v22  ;;  %v2364_v29 = vadd.f32 %v1627_v51, %v780_v24 }
 0x171   : > { %v2343_v7 = vadd.f32 %v1627_v51, %v773_v2  ;;  %815 = vmax.xlane.f32.xlu0 %v2340_v5 }
 0x172   : > { %v2367_v31 = vadd.f32 %v1627_v51, %v781_v26 }
 0x173   : > { %817 = vmax.xlane.f32.xlu1 %v2343_v7 }
 0x174   : > { %v751_v3 = vld [vmem:[#allocation2 + $0x30] sm:$0xff] }
 0x175   : > { %v774_v6 = vmul.f32 %v1626_v50, %v751_v3  ;;  %v759_v27 = vld [vmem:[#allocation2 + $0x70] sm:$0xff] }
 0x176   : > { %v752_v4 = vld [vmem:[#allocation2 + $0x38] sm:$0xff]  ;;  %v782_v30 = vmul.f32 %v1626_v50, %v759_v27 }
 0x177   : > { %v775_v8 = vmul.f32 %v1626_v50, %v752_v4  ;;  %v2346_v11 = vadd.f32 %v1627_v51, %v774_v6  ;;  %v760_v28 = vld [vmem:[#allocation2 + $0x78] sm:$0xff] }
 0x178   : > { %v783_v32 = vmul.f32 %v1626_v50, %v760_v28  ;;  %v2370_v33 = vadd.f32 %v1627_v51, %v782_v30 }
 0x179   : > { %v2349_v13 = vadd.f32 %v1627_v51, %v775_v8  ;;  %819 = vmax.xlane.f32.xlu0 %v2346_v11 }
 0x17a   : > { %v2373_v34 = vadd.f32 %v1627_v51, %v783_v32 }
 0x17b   : > { %821 = vmax.xlane.f32.xlu1 %v2349_v13 }
 0x17d   : > { %823 = vmax.xlane.f32.xlu0 %v2352_v17 }
 0x17f   : > { %825 = vmax.xlane.f32.xlu1 %v2355_v19 }
 0x181   : > { %827 = vmax.xlane.f32.xlu0 %v2358_v23 }
 0x183   : > { %829 = vmax.xlane.f32.xlu1 %v2361_v25 }
 0x185   : > { %831 = vmax.xlane.f32.xlu0 %v2364_v29 }
 0x187   : > { %833 = vmax.xlane.f32.xlu1 %v2367_v31 }
 0x189   : > { %835 = vmax.xlane.f32.xlu0 %v2370_v33 }
 0x18b   : > { %837 = vmax.xlane.f32.xlu1 %v2373_v34 }
 0x1ee   : > { %v2379_v37 = vpop.xlane.xlu0 %807 }
 0x1ef   : > { %vm969_vm0 = vcmp.eq.f32.partialorder %v2329_v60, %v2379_v37  ;;  %v839_v20 = vsub.f32 %v2329_v60, %v2379_v37 }
 0x1f0   : > { %v2386_v39 = vsel %vm969_vm0, %v2377_v36, 128 }
 0x1f1   : > { %v1002_v41 = vshra.s32 %v2386_v39, 16  ;;  %v855_v35 = vmul.f32 1.442695, %v839_v20 }
 0x1f2   : > { %v2394_v42 = vpop.xlane.xlu0 %809 }
 0x1f3   : > { %vm970_vm2 = vcmp.eq.f32.partialorder %v2334_v63, %v2394_v42  ;;  %v2399_v44 = vcvt.s32.f32 %v1002_v41  ;;  %1841 = vpow2.f32 %v855_v35 }
 0x1f4   : > { %v2404_v46 = vsel %vm970_vm2, %v2377_v36, 128 }
 0x1f5   : > { %1005 = vmin.xlane.f32.xlu0 %v2399_v44  ;;  %v1016_v49 = vshra.s32 %v2404_v46, 16 }
 0x1f6   : > { %v2383_v38 = vpop.xlane.xlu1 %811 }
 0x1f7   : > { %vm971_vm1 = vcmp.eq.f32.partialorder %v2331_v62, %v2383_v38  ;;  %v2420_v52 = vcvt.s32.f32 %v1016_v49  ;;  %v841_v27 = vsub.f32 %v2331_v62, %v2383_v38  ;;  %v840_v62 = vsub.f32 %v2334_v63, %v2394_v42 }
 0x1f8   : > { %v2391_v40 = vsel %vm971_vm1, %v2377_v36, 128 }
 0x1f9   : > { %v1030_v43 = vshra.s32 %v2391_v40, 16  ;;  %1019 = vmin.xlane.f32.xlu1 %v2420_v52  ;;  %v859_v49 = vmul.f32 1.442695, %v841_v27 }
 0x1fa   : > { %v2401_v45 = vpop.xlane.xlu1 %813 }
 0x1fb   : > { %vm972_vm3 = vcmp.eq.f32.partialorder %v2337_v1, %v2401_v45  ;;  %v2412_v48 = vcvt.s32.f32 %v1030_v43  ;;  %1843 = vpow2.f32 %v859_v49 }
 0x1fc   : > { %v2410_v47 = vsel %vm972_vm3, %v2377_v36, 128 }
 0x1fd   : > { %v1044_v51 = vshra.s32 %v2410_v47, 16  ;;  %1033 = vmin.xlane.f32.xlu0 %v2412_v48 }
 0x1fe   : > { %v2415_v50 = vpop.xlane.xlu0 %815 }
 0x1ff   : > { %vm973_vm4 = vcmp.eq.f32.partialorder %v2340_v5, %v2415_v50  ;;  %v2434_v56 = vcvt.s32.f32 %v1044_v51  ;;  %v842_v51 = vsub.f32 %v2337_v1, %v2401_v45  ;;  %v843_v1 = vsub.f32 %v2340_v5, %v2415_v50 }
 0x200   : > { %v2422_v53 = vpop.xlane.xlu1 %817  ;;  %v2425_v54 = vsel %vm973_vm4, %v2377_v36, 128 }
 0x201   : > { %vm974_vm5 = vcmp.eq.f32.partialorder %v2343_v7, %v2422_v53  ;;  %v1058_v57 = vshra.s32 %v2425_v54, 16  ;;  %1047 = vmin.xlane.f32.xlu1 %v2434_v56  ;;  %v844_v5 = vsub.f32 %v2343_v7, %v2422_v53 }
 0x202   : > { %v2432_v55 = vsel %vm974_vm5, %v2377_v36, 128 }
 0x203   : > { %v1072_v59 = vshra.s32 %v2432_v55, 16  ;;  %v2442_v61 = vcvt.s32.f32 %v1058_v57  ;;  %v865_v7 = vmul.f32 1.442695, %v844_v5 }
 0x205   : > { %1061 = vmin.xlane.f32.xlu0 %v2442_v61  ;;  %v2456_v4 = vcvt.s32.f32 %v1072_v59 }
 0x206   : > { %v2437_v58 = vpop.xlane.xlu0 %819 }
 0x207   : > { %vm975_vm6 = vcmp.eq.f32.partialorder %v2346_v11, %v2437_v58  ;;  %1075 = vmin.xlane.f32.xlu1 %v2456_v4 }
 0x208   : > { %v2444_v0 = vpop.xlane.xlu1 %821  ;;  %v2447_v2 = vsel %vm975_vm6, %v2377_v36, 128 }
 0x209   : > { %vm976_vm7 = vcmp.eq.f32.partialorder %v2349_v13, %v2444_v0  ;;  %v1086_v6 = vshra.s32 %v2447_v2, 16  ;;  %v846_v53 = vsub.f32 %v2349_v13, %v2444_v0 }
 0x20a   : > { %v2454_v3 = vsel %vm976_vm7, %v2377_v36, 128  ;;  %v2459_v8 = vpop.xlane.xlu0 %823 }
 0x20b   : > { %v1100_v9 = vshra.s32 %v2454_v3, 16  ;;  %vm977_vm8 = vcmp.eq.f32.partialorder %v2352_v17, %v2459_v8  ;;  %v2464_v10 = vcvt.s32.f32 %v1086_v6  ;;  %v857_v6 = vmul.f32 1.442695, %v840_v62 }
 0x20c   : > { %v2466_v12 = vpop.xlane.xlu1 %825  ;;  %v2469_v14 = vsel %vm977_vm8, %v2377_v36, 128  ;;  %v863_v62 = vmul.f32 1.442695, %v843_v1  ;;  %v869_v1 = vmul.f32 1.442695, %v846_v53 }
 0x20d   : > { %vm978_vm9 = vcmp.eq.f32.partialorder %v2355_v19, %v2466_v12  ;;  %1089 = vmin.xlane.f32.xlu0 %v2464_v10  ;;  %v2478_v16 = vcvt.s32.f32 %v1100_v9  ;;  %v1114_v18 = vshra.s32 %v2469_v14, 16  ;;  %1845 = vpow2.f32 %v857_v6 }
 0x20e   : > { %v2476_v15 = vsel %vm978_vm9, %v2377_v36, 128  ;;  %v2483_v21 = vpop.xlane.xlu0 %827 }
 0x20f   : > { %v1128_v22 = vshra.s32 %v2476_v15, 16  ;;  %vm979_vm10 = vcmp.eq.f32.partialorder %v2358_v23, %v2483_v21  ;;  %v2488_v24 = vcvt.s32.f32 %v1114_v18  ;;  %1103 = vmin.xlane.f32.xlu1 %v2478_v16 }
 0x210   : > { %v2490_v26 = vpop.xlane.xlu1 %829  ;;  %v2495_v28 = vsel %vm979_vm10, %v2377_v36, 128 }
 0x211   : > { %vm980_vm11 = vcmp.eq.f32.partialorder %v2361_v25, %v2490_v26  ;;  %1117 = vmin.xlane.f32.xlu0 %v2488_v24  ;;  %v2504_v30 = vcvt.s32.f32 %v1128_v22  ;;  %v1142_v32 = vshra.s32 %v2495_v28, 16  ;;  %v861_v22 = vmul.f32 1.442695, %v842_v51 }
 0x212   : > { %v2502_v60 = vsel %vm980_vm11, %v2377_v36, 128  ;;  %v2509_v37 = vpop.xlane.xlu0 %831 }
 0x213   : > { %v1156_v38 = vshra.s32 %v2502_v60, 16  ;;  %vm981_vm12 = vcmp.eq.f32.partialorder %v2364_v29, %v2509_v37  ;;  %v2514_v41 = vcvt.s32.f32 %v1142_v32  ;;  %1131 = vmin.xlane.f32.xlu1 %v2504_v30  ;;  %1847 = vpow2.f32 %v861_v22 }
 0x214   : > { %v2516_v43 = vpop.xlane.xlu1 %833  ;;  %v2521_v57 = vsel %vm981_vm12, %v2377_v36, 128  ;;  %1849 = vpow2.f32 %v863_v62  ;;  %v849_v22 = vsub.f32 %v2358_v23, %v2483_v21 }
 0x215   : > { %vm982_vm13 = vcmp.eq.f32.partialorder %v2367_v31, %v2516_v43  ;;  %1145 = vmin.xlane.f32.xlu0 %v2514_v41  ;;  %v2530_v42 = vcvt.s32.f32 %v1156_v38  ;;  %v1170_v59 = vshra.s32 %v2521_v57, 16  ;;  %v845_v38 = vsub.f32 %v2346_v11, %v2437_v58  ;;  %v2572_v58 = vpop.eup %1841 }
 0x216   : > { %v2528_v63 = vsel %vm982_vm13, %v2377_v36, 128  ;;  %v2535_v45 = vpop.xlane.xlu0 %835  ;;  %v847_v11 = vsub.f32 %v2352_v17, %v2459_v8  ;;  %1851 = vpow2.f32 %v865_v7  ;;  %v2578_v13 = vpop.eup %1843  ;;  %v850_v8 = vsub.f32 %v2361_v25, %v2490_v26 }
 0x217   : > { %v1184_v9 = vshra.s32 %v2528_v63, 16  ;;  %vm983_vm14 = vcmp.eq.f32.partialorder %v2370_v33, %v2535_v45  ;;  %v2540_v18 = vcvt.s32.f32 %v1170_v59  ;;  %1159 = vmin.xlane.f32.xlu1 %v2530_v42  ;;  %v867_v6 = vmul.f32 1.442695, %v845_v38  ;;  %v2582_v5 = vpop.eup %1845 }
 0x218   : > { %v2542_v20 = vpop.xlane.xlu1 %837  ;;  %v2545_v27 = vsel %vm983_vm14, %v2377_v36, 128  ;;  %v871_v0 = vmul.f32 1.442695, %v847_v11  ;;  %v877_v23 = vmul.f32 1.442695, %v850_v8  ;;  %v852_v21 = vsub.f32 %v2367_v31, %v2516_v43 }
 0x219   : > { %vm984_vm15 = vcmp.eq.f32.partialorder %v2373_v34, %v2542_v20  ;;  %1173 = vmin.xlane.f32.xlu0 %v2540_v18  ;;  %v2556_v32 = vcvt.s32.f32 %v1184_v9  ;;  %v1198_v35 = vshra.s32 %v2545_v27, 16  ;;  %v848_v9 = vsub.f32 %v2355_v19, %v2466_v12 }
 0x21a   : > { %v2554_v50 = vsel %vm984_vm15, %v2377_v36, 128  ;;  %1853 = vpow2.f32 %v867_v6  ;;  %v875_v19 = vmul.f32 1.442695, %v849_v22  ;;  %v851_v12 = vsub.f32 %v2364_v29, %v2509_v37 }
 0x21b   : > { %v1212_v49 = vshra.s32 %v2554_v50, 16  ;;  %v2562_v51 = vcvt.s32.f32 %v1198_v35  ;;  %1187 = vmin.xlane.f32.xlu1 %v2556_v32  ;;  %1855 = vpow2.f32 %v869_v1  ;;  %v873_v17 = vmul.f32 1.442695, %v848_v9 }
 0x21c   : > { %1857 = vpow2.f32 %v871_v0  ;;  %v879_v25 = vmul.f32 1.442695, %v851_v12  ;;  %v853_v26 = vsub.f32 %v2370_v33, %v2535_v45  ;;  %v881_v37 = vmul.f32 1.442695, %v852_v21 }
 0x21d   : > { %1201 = vmin.xlane.f32.xlu0 %v2562_v51  ;;  %v2568_v59 = vcvt.s32.f32 %v1212_v49  ;;  %v2590_v35 = vpop.eup %1847  ;;  %1859 = vpow2.f32 %v873_v17  ;;  %v854_v43 = vsub.f32 %v2373_v34, %v2542_v20  ;;  %v2089_v1 = vmov 0  }
 0x21e   : > { %v2592_v62 = vpop.eup %1849  ;;  %1861 = vpow2.f32 %v875_v19  ;;  %v883_v31 = vmul.f32 1.442695, %v853_v26  ;;  %1839 = vset.pattern.permute.xlu0 %v2089_v1  ;;  %1840 = vset.pattern.permute.xlu1 %v2089_v1  ;;  %v1001_v0 = vand.u32 65535, %v2386_v39  ;;  %v1015_v8 = vand.u32 65535, %v2404_v46 }
 0x21f   : > { %1215 = vmin.xlane.f32.xlu1 %v2568_v59  ;;  %1863 = vpow2.f32 %v877_v23  ;;  %v885_v33 = vmul.f32 1.442695, %v854_v43  ;;  %v1029_v19 = vand.u32 65535, %v2391_v40  ;;  %v1043_v39 = vand.u32 65535, %v2410_v47 }
 0x220   : > { %v2600_v38 = vpop.eup %1851  ;;  %1865 = vpow2.f32 %v879_v25  ;;  %v1003_v17 = vcvt.s32.f32 %v1001_v0  ;;  %v1017_v25 = vcvt.s32.f32 %v1015_v8  ;;  %v1071_v47 = vand.u32 65535, %v2432_v55 }
 0x221   : > { %887 = vadd.xlane.f32.xlu0 %v2572_v58  ;;  %1867 = vpow2.f32 %v881_v37  ;;  %v1031_v26 = vcvt.s32.f32 %v1029_v19  ;;  %v1057_v37 = vand.u32 65535, %v2425_v54  ;;  %v1045_v43 = vcvt.s32.f32 %v1043_v39 }
 0x222   : > { %1869 = vpow2.f32 %v883_v31  ;;  %v1085_v54 = vand.u32 65535, %v2447_v2  ;;  %v1073_v8 = vcvt.s32.f32 %v1071_v47  ;;  %v1099_v55 = vand.u32 65535, %v2454_v3 }
 0x223   : > { %889 = vadd.xlane.f32.xlu1 %v2582_v5  ;;  %1871 = vpow2.f32 %v885_v33  ;;  %v1059_v33 = vcvt.s32.f32 %v1057_v37  ;;  %v1113_v2 = vand.u32 65535, %v2469_v14  ;;  %v1127_v3 = vand.u32 65535, %v2476_v15 }
 0x224   : > { %v2602_v29 = vpop.eup %1853  ;;  %v1087_v19 = vcvt.s32.f32 %v1085_v54  ;;  %v1141_v14 = vand.u32 65535, %v2495_v28  ;;  %v1155_v15 = vand.u32 65535, %v2502_v60  ;;  %v1169_v28 = vand.u32 65535, %v2521_v57 }
 0x225   : > { %891 = vadd.xlane.f32.xlu0 %v2578_v13  ;;  %v2608_v49 = vpop.eup %1855  ;;  %v1115_v39 = vcvt.s32.f32 %v1113_v2  ;;  %v1183_v60 = vand.u32 65535, %v2528_v63  ;;  %v1197_v57 = vand.u32 65535, %v2545_v27  ;;  %v1211_v63 = vand.u32 65535, %v2554_v50 }
 0x226   : > { %v2610_v7 = vpop.eup %1857  ;;  %v1157_v54 = vcvt.s32.f32 %v1155_v15 }
 0x227   : > { %893 = vadd.xlane.f32.xlu1 %v2590_v35  ;;  %v2614_v45 = vpop.eup %1859 }
 0x228   : > { %v2616_v53 = vpop.eup %1861 }
 0x229   : > { %895 = vadd.xlane.f32.xlu0 %v2592_v62  ;;  %v2620_v34 = vpop.eup %1863 }
 0x22a   : > { %v2622_v20 = vpop.eup %1865 }
 0x22b   : > { %897 = vadd.xlane.f32.xlu1 %v2600_v38  ;;  %v2626_v6 = vpop.eup %1867 }
 0x22c   : > { %v2628_v11 = vpop.eup %1869 }
 0x22d   : > { %899 = vadd.xlane.f32.xlu0 %v2602_v29  ;;  %v2634_v9 = vpop.eup %1871 }
 0x22f   : > { %901 = vadd.xlane.f32.xlu1 %v2608_v49 }
 0x231   : > { %903 = vadd.xlane.f32.xlu0 %v2610_v7 }
 0x233   : > { %905 = vadd.xlane.f32.xlu1 %v2614_v45 }
 0x235   : > { %907 = vadd.xlane.f32.xlu0 %v2616_v53 }
 0x237   : > { %909 = vadd.xlane.f32.xlu1 %v2620_v34 }
 0x239   : > { %911 = vadd.xlane.f32.xlu0 %v2622_v20 }
 0x23b   : > { %913 = vadd.xlane.f32.xlu1 %v2626_v6 }
 0x23d   : > { %915 = vadd.xlane.f32.xlu0 %v2628_v11 }
 0x23f   : > { %917 = vadd.xlane.f32.xlu1 %v2634_v9 }
 0x282   : > { %v2638_v22 = vpop.xlane.xlu0 %1005 }
 0x283   : > { %vm1007_vm0 = vcmp.eq.f32.partialorder %v2399_v44, %v2638_v22 }
 0x284   : > { %v1008_v12 = vsel %vm1007_vm0, %v1003_v17, inf }
 0x285   : > { %1009 = vmin.xlane.f32.xlu0 %v1008_v12 }
 0x286   : > { %v2644_v23 = vpop.xlane.xlu1 %1019 }
 0x287   : > { %vm1021_vm1 = vcmp.eq.f32.partialorder %v2420_v52, %v2644_v23 }
 0x288   : > { %v1022_v40 = vsel %vm1021_vm1, %v1017_v25, inf }
 0x289   : > { %1023 = vmin.xlane.f32.xlu1 %v1022_v40 }
 0x28a   : > { %v2646_v21 = vpop.xlane.xlu0 %1033 }
 0x28b   : > { %vm1035_vm2 = vcmp.eq.f32.partialorder %v2412_v48, %v2646_v21 }
 0x28c   : > { %v1036_v44 = vsel %vm1035_vm2, %v1031_v26, inf  ;;  %v1101_v26 = vcvt.s32.f32 %v1099_v55  ;;  %v1199_v55 = vcvt.s32.f32 %v1197_v57 }
 0x28d   : > { %1037 = vmin.xlane.f32.xlu0 %v1036_v44  ;;  %v1129_v44 = vcvt.s32.f32 %v1127_v3 }
 0x28e   : > { %v2654_v46 = vpop.xlane.xlu1 %1047 }
 0x28f   : > { %vm1049_vm3 = vcmp.eq.f32.partialorder %v2434_v56, %v2654_v46 }
 0x290   : > { %v1050_v48 = vsel %vm1049_vm3, %v1045_v43, inf  ;;  %v1143_v43 = vcvt.s32.f32 %v1141_v14 }
 0x291   : > { %1051 = vmin.xlane.f32.xlu1 %v1050_v48  ;;  %v1171_v48 = vcvt.s32.f32 %v1169_v28 }
 0x292   : > { %v2656_v31 = vpop.xlane.xlu0 %1061 }
 0x293   : > { %vm1063_vm4 = vcmp.eq.f32.partialorder %v2442_v61, %v2656_v31 }
 0x294   : > { %v1064_v52 = vsel %vm1063_vm4, %v1059_v33, inf  ;;  %v2664_v0 = vpop.xlane.xlu1 %1075 }
 0x295   : > { %1065 = vmin.xlane.f32.xlu0 %v1064_v52  ;;  %vm1077_vm5 = vcmp.eq.f32.partialorder %v2456_v4, %v2664_v0 }
 0x296   : > { %v1078_v56 = vsel %vm1077_vm5, %v1073_v8, inf }
 0x297   : > { %1079 = vmin.xlane.f32.xlu1 %v1078_v56  ;;  %v1213_v56 = vcvt.s32.f32 %v1211_v63 }
 0x29a   : > { %v2666_v17 = vpop.xlane.xlu0 %1089 }
 0x29b   : > { %vm1091_vm6 = vcmp.eq.f32.partialorder %v2464_v10, %v2666_v17 }
 0x29c   : > { %v1092_v61 = vsel %vm1091_vm6, %v1087_v19, inf  ;;  %v2674_v12 = vpop.xlane.xlu1 %1103  ;;  %v1185_v19 = vcvt.s32.f32 %v1183_v60 }
 0x29d   : > { %1093 = vmin.xlane.f32.xlu0 %v1092_v61  ;;  %vm1105_vm7 = vcmp.eq.f32.partialorder %v2478_v16, %v2674_v12 }
 0x29e   : > { %v2676_v25 = vpop.xlane.xlu0 %1117  ;;  %v1106_v4 = vsel %vm1105_vm7, %v1101_v26, inf }
 0x29f   : > { %vm1119_vm8 = vcmp.eq.f32.partialorder %v2488_v24, %v2676_v25  ;;  %1107 = vmin.xlane.f32.xlu1 %v1106_v4 }
 0x2a0   : > { %v1120_v10 = vsel %vm1119_vm8, %v1115_v39, inf  ;;  %v2684_v37 = vpop.xlane.xlu1 %1131 }
 0x2a1   : > { %1121 = vmin.xlane.f32.xlu0 %v1120_v10  ;;  %vm1133_vm9 = vcmp.eq.f32.partialorder %v2504_v30, %v2684_v37 }
 0x2a2   : > { %v2686_v40 = vpop.xlane.xlu0 %1145  ;;  %v1134_v16 = vsel %vm1133_vm9, %v1129_v44, inf }
 0x2a3   : > { %vm1147_vm10 = vcmp.eq.f32.partialorder %v2514_v41, %v2686_v40  ;;  %1135 = vmin.xlane.f32.xlu1 %v1134_v16 }
 0x2a4   : > { %v1148_v24 = vsel %vm1147_vm10, %v1143_v43, inf  ;;  %v2694_v33 = vpop.xlane.xlu1 %1159 }
 0x2a5   : > { %1149 = vmin.xlane.f32.xlu0 %v1148_v24  ;;  %vm1161_vm11 = vcmp.eq.f32.partialorder %v2530_v42, %v2694_v33 }
 0x2a6   : > { %v2696_v47 = vpop.xlane.xlu0 %1173  ;;  %v1162_v30 = vsel %vm1161_vm11, %v1157_v54, inf }
 0x2a7   : > { %vm1175_vm12 = vcmp.eq.f32.partialorder %v2540_v18, %v2696_v47  ;;  %1163 = vmin.xlane.f32.xlu1 %v1162_v30 }
 0x2a8   : > { %v1176_v41 = vsel %vm1175_vm12, %v1171_v48, inf  ;;  %v2704_v52 = vpop.xlane.xlu1 %1187 }
 0x2a9   : > { %1177 = vmin.xlane.f32.xlu0 %v1176_v41  ;;  %vm1189_vm13 = vcmp.eq.f32.partialorder %v2556_v32, %v2704_v52 }
 0x2aa   : > { %v2706_v8 = vpop.xlane.xlu0 %1201  ;;  %v1190_v42 = vsel %vm1189_vm13, %v1185_v19, inf }
 0x2ab   : > { %vm1203_vm14 = vcmp.eq.f32.partialorder %v2562_v51, %v2706_v8  ;;  %1191 = vmin.xlane.f32.xlu1 %v1190_v42 }
 0x2ac   : > { %v1204_v18 = vsel %vm1203_vm14, %v1199_v55, inf  ;;  %v2713_v27 = vpop.xlane.xlu1 %1215 }
 0x2ad   : > { %1205 = vmin.xlane.f32.xlu0 %v1204_v18  ;;  %vm1217_vm15 = vcmp.eq.f32.partialorder %v2568_v59, %v2713_v27 }
 0x2ae   : > { %v888_v2 = vpop.xlane.xlu0 %887  ;;  %v1218_v61 = vsel %vm1217_vm15, %v1213_v56, inf }
 0x2af   : > { %1873 = vrcp.f32 %v888_v2  ;;  %1219 = vmin.xlane.f32.xlu1 %v1218_v61 }
 0x2b0   : > { %v890_v50 = vpop.xlane.xlu1 %889 }
 0x2b1   : > { %1875 = vrcp.f32 %v890_v50 }
 0x2b2   : > { %v892_v26 = vpop.xlane.xlu0 %891 }
 0x2b3   : > { %1877 = vrcp.f32 %v892_v26 }
 0x2b4   : > { %v894_v32 = vpop.xlane.xlu1 %893 }
 0x2b5   : > { %1879 = vrcp.f32 %v894_v32 }
 0x2b6   : > { %v896_v51 = vpop.xlane.xlu0 %895 }
 0x2b7   : > { %1881 = vrcp.f32 %v896_v51 }
 0x2b8   : > { %v898_v14 = vpop.xlane.xlu1 %897 }
 0x2b9   : > { %v2717_v39 = vpop.eup %1873  ;;  %1883 = vrcp.f32 %v898_v14  ;;  %v1026_v14 = vcvt.f32.s32 %v2644_v23 }
 0x2ba   : > { %v935_v3 = vmul.f32 %v2717_v39, %v2572_v58  ;;  %v900_v4 = vpop.xlane.xlu0 %899  ;;  %vm1225_vm0 = vcmp.gt.f32.partialorder %v2717_v39, 0.945  ;;  %v1259_v39 = vld [vmem:[%s3211_s4 + $0x10] sm:$0xff] }
 0x2bb   : > { %1885 = vrcp.f32 %v900_v4  ;;  %v2721_v59 = vpop.eup %1875 }
 0x2bc   : > { %951 = vst [vmem:[#allocation8] sm:$0xff] %v935_v3  ;;  %v936_v44 = vmul.f32 %v2721_v59, %v2582_v5  ;;  %v902_v43 = vpop.xlane.xlu1 %901  ;;  %vm1226_vm2 = vcmp.gt.f32.partialorder %v2721_v59, 0.945 }
 0x2bd   : > { %v2723_v10 = vpop.eup %1877  ;;  %1887 = vrcp.f32 %v902_v43  ;;  %v1040_v43 = vcvt.f32.s32 %v2646_v21  ;;  %v1068_v21 = vcvt.f32.s32 %v2656_v31 }
 0x2be   : > { %v904_v15 = vpop.xlane.xlu0 %903  ;;  %v937_v28 = vmul.f32 %v2723_v10, %v2578_v13  ;;  %952 = vst [vmem:[#allocation8 + $0x8] sm:$0xff] %v936_v44  ;;  %vm1227_vm5 = vcmp.gt.f32.partialorder %v2723_v10, 0.945  ;;  %v1096_v10 = vcvt.f32.s32 %v2666_v17  ;;  %v1124_v17 = vcvt.f32.s32 %v2676_v25 }
 0x2bf   : > { %1889 = vrcp.f32 %v904_v15  ;;  %v2729_v58 = vpop.eup %1879  ;;  %v1180_v25 = vcvt.f32.s32 %v2696_v47  ;;  %v1266_v47 = vld [vmem:[%s3211_s4 + $0x48] sm:$0xff] }
 0x2c0   : > { %953 = vst [vmem:[#allocation8 + $0x10] sm:$0xff] %v937_v28  ;;  %v938_v24 = vmul.f32 %v2729_v58, %v2590_v35  ;;  %v906_v54 = vpop.xlane.xlu1 %905  ;;  %v1027_v28 = vshll.u32 %v1026_v14, 16  ;;  %vm1228_vm7 = vcmp.gt.f32.partialorder %v2729_v58, 0.945  ;;  %v1166_v58 = vcvt.f32.s32 %v2694_v33 }
 0x2c1   : > { %v2731_v16 = vpop.eup %1881  ;;  %1891 = vrcp.f32 %v906_v54  ;;  %v1041_v54 = vshll.u32 %v1040_v43, 16 }
 0x2c2   : > { %v908_v48 = vpop.xlane.xlu0 %907  ;;  %v939_v5 = vmul.f32 %v2731_v16, %v2592_v62  ;;  %954 = vst [vmem:[#allocation8 + $0x18] sm:$0xff] %v938_v24  ;;  %vm1229_vm9 = vcmp.gt.f32.partialorder %v2731_v16, 0.945 }
 0x2c3   : > { %1893 = vrcp.f32 %v908_v48  ;;  %v2737_v13 = vpop.eup %1883 }
 0x2c4   : > { %955 = vst [vmem:[#allocation8 + $0x20] sm:$0xff] %v939_v5  ;;  %v940_v57 = vmul.f32 %v2737_v13, %v2600_v38  ;;  %v910_v30 = vpop.xlane.xlu1 %909  ;;  %v1258_v5 = vld [vmem:[%s3211_s4 + $0x8] sm:$0xff]  ;;  %vm1230_vm12 = vcmp.gt.f32.partialorder %v2737_v13, 0.945 }
 0x2c5   : > { %v2739_v60 = vpop.eup %1885  ;;  %1895 = vrcp.f32 %v910_v30 }
 0x2c6   : > { %v912_v41 = vpop.xlane.xlu0 %911  ;;  %v941_v35 = vmul.f32 %v2739_v60, %v2602_v29  ;;  %956 = vst [vmem:[#allocation8 + $0x28] sm:$0xff] %v940_v57  ;;  %v2800_v57 = vsel %vm1225_vm0, 1, %v2089_v1  ;;  %vm1231_vm15 = vcmp.gt.f32.partialorder %v2739_v60, 0.945 }
 0x2c7   : > { %1897 = vrcp.f32 %v912_v41  ;;  %v2745_v62 = vpop.eup %1887 }
 0x2c8   : > { %957 = vst [vmem:[#allocation8 + $0x30] sm:$0xff] %v941_v35  ;;  %v942_v55 = vmul.f32 %v2745_v62, %v2608_v49  ;;  %v914_v63 = vpop.xlane.xlu1 %913 }
 0x2c9   : > { %v2747_v19 = vpop.eup %1889  ;;  %1899 = vrcp.f32 %v914_v63 }
 0x2ca   : > { %v916_v42 = vpop.xlane.xlu0 %915  ;;  %v943_v38 = vmul.f32 %v2747_v19, %v2610_v7  ;;  %958 = vst [vmem:[#allocation8 + $0x38] sm:$0xff] %v942_v55 }
 0x2cb   : > { %1901 = vrcp.f32 %v916_v42  ;;  %v2753_v29 = vpop.eup %1891 }
 0x2cc   : > { %959 = vst [vmem:[#allocation8 + $0x40] sm:$0xff] %v943_v38  ;;  %v944_v2 = vmul.f32 %v2753_v29, %v2614_v45  ;;  %v918_v56 = vpop.xlane.xlu1 %917  ;;  %vm1234_vm11 = vcmp.gt.f32.partialorder %v2753_v29, 0.945 }
 0x2cd   : > { %v2755_v18 = vpop.eup %1893  ;;  %1903 = vrcp.f32 %v918_v56  ;;  %v1260_v56 = vld [vmem:[%s3211_s4 + $0x18] sm:$0xff]  ;;  %v2893_v29 = vsel %vm1234_vm11, 1, %v2089_v1 }
 0x2ce   : > { %v945_v49 = vmul.f32 %v2755_v18, %v2616_v53  ;;  %960 = vst [vmem:[#allocation8 + $0x48] sm:$0xff] %v944_v2  ;;  %v1069_v2 = vshll.u32 %v1068_v21, 16  ;;  %v1097_v21 = vshll.u32 %v1096_v10, 16  ;;  %vm1235_vm11 = vcmp.gt.f32.partialorder %v2755_v18, 0.945 }
 0x2cf   : > { %v2761_v61 = vpop.eup %1895 }
 0x2d0   : > { %961 = vst [vmem:[#allocation8 + $0x50] sm:$0xff] %v945_v49  ;;  %v946_v50 = vmul.f32 %v2761_v61, %v2620_v34  ;;  %v2815_v49 = vsel %vm1226_vm2, 1, %v2089_v1  ;;  %vm1236_vm0 = vcmp.gt.f32.partialorder %v2761_v61, 0.945 }
 0x2d1   : > { %v2763_v7 = vpop.eup %1897 }
 0x2d2   : > { %v947_v26 = vmul.f32 %v2763_v7, %v2622_v20  ;;  %962 = vst [vmem:[#allocation8 + $0x58] sm:$0xff] %v946_v50  ;;  %v1012_v20 = vcvt.f32.s32 %v2638_v22  ;;  %v1082_v50 = vcvt.f32.s32 %v2664_v0  ;;  %v1261_v0 = vld [vmem:[%s3211_s4 + $0x20] sm:$0xff] }
 0x2d3   : > { %v2769_v32 = vpop.eup %1899 }
 0x2d4   : > { %963 = vst [vmem:[#allocation8 + $0x60] sm:$0xff] %v947_v26  ;;  %v948_v53 = vmul.f32 %v2769_v32, %v2626_v6  ;;  %v1013_v44 = vshll.u32 %v1012_v20, 16  ;;  %v1083_v43 = vshll.u32 %v1082_v50, 16 }
 0x2d5   : > { %v2771_v45 = vpop.eup %1901 }
 0x2d6   : > { %v949_v51 = vmul.f32 %v2771_v45, %v2628_v11  ;;  %964 = vst [vmem:[#allocation8 + $0x68] sm:$0xff] %v948_v53  ;;  %v1257_v11 = vld [vmem:[%s3211_s4] sm:$0xff] }
 0x2d7   : > { %v2777_v3 = vpop.eup %1903 }
 0x2d8   : > { %965 = vst [vmem:[#allocation8 + $0x70] sm:$0xff] %v949_v51  ;;  %v950_v34 = vmul.f32 %v2777_v3, %v2634_v9  ;;  %v1054_v9 = vcvt.f32.s32 %v2654_v46 }
 0x2da   : > { %966 = vst [vmem:[#allocation8 + $0x78] sm:$0xff] %v950_v34  ;;  %v1055_v31 = vshll.u32 %v1054_v9, 16 }
 0x312   : > { %v1010_v4 = vpop.xlane.xlu0 %1009 }
 0x313   : > { %v1011_v6 = vcvt.f32.s32 %v1010_v4 }
 0x315   : > { %v2787_v15 = vadd.s32 %v1013_v44, %v1011_v6  ;;  %v2831_v44 = vsel %vm1227_vm5, 1, %v2089_v1 }
 0x316   : > { %v1024_v24 = vpop.xlane.xlu1 %1023 }
 0x317   : > { %vm1273_vm1 = vcmp.eq.s32.totalorder %v2787_v15, %v1257_v11  ;;  %v1025_v23 = vcvt.f32.s32 %v1024_v24  ;;  %v1110_v11 = vcvt.f32.s32 %v2674_v12  ;;  %v1262_v12 = vld [vmem:[%s3211_s4 + $0x28] sm:$0xff] }
 0x318   : > { %v1289_v46 = vsel %vm1273_vm1, 1, %v2089_v1 }
 0x319   : > { %v2803_v30 = vadd.s32 %v1027_v28, %v1025_v23  ;;  %v1305_v35 = vmul.u32 %v1289_v46, %v2800_v57  ;;  %v1138_v28 = vcvt.f32.s32 %v2684_v37  ;;  %v2849_v37 = vsel %vm1228_vm7, 1, %v2089_v1 }
 0x31a   : > { %v1038_v22 = vpop.xlane.xlu0 %1037  ;;  %vm1233_vm7 = vcmp.gt.f32.partialorder %v2747_v19, 0.945  ;;  %v1269_v19 = vld [vmem:[%s3211_s4 + $0x60] sm:$0xff] }
 0x31b   : > { %v1039_v48 = vcvt.f32.s32 %v1038_v22  ;;  %vm1274_vm3 = vcmp.eq.s32.totalorder %v2803_v30, %v1258_v5  ;;  %1325 = vperm.xlu0 %1839, %v1305_v35   ;;  %v1139_v46 = vshll.u32 %v1138_v28, 16 }
 0x31c   : > { %v1290_v59 = vsel %vm1274_vm3, 1, %v2089_v1  ;;  %vm1232_vm3 = vcmp.gt.f32.partialorder %v2745_v62, 0.945 }
 0x31d   : > { %v2805_v41 = vadd.s32 %v1041_v54, %v1039_v48  ;;  %v1306_v53 = vmul.u32 %v1290_v59, %v2815_v49  ;;  %v1152_v48 = vcvt.f32.s32 %v2686_v40  ;;  %v2869_v59 = vsel %vm1229_vm9, 1, %v2089_v1 }
 0x31e   : > { %v1052_v55 = vpop.xlane.xlu1 %1051 }
 0x31f   : > { %vm1275_vm4 = vcmp.eq.s32.totalorder %v2805_v41, %v1259_v39  ;;  %v1053_v42 = vcvt.f32.s32 %v1052_v55  ;;  %1328 = vperm.xlu1 %1840, %v1306_v53   ;;  %v1111_v39 = vshll.u32 %v1110_v11, 16 }
 0x320   : > { %v1291_v20 = vsel %vm1275_vm4, 1, %v2089_v1  ;;  %vm1238_vm4 = vcmp.gt.f32.partialorder %v2769_v32, 0.945 }
 0x321   : > { %v2819_v26 = vadd.s32 %v1055_v31, %v1053_v42  ;;  %v1307_v6 = vmul.u32 %v1291_v20, %v2831_v44  ;;  %v1153_v42 = vshll.u32 %v1152_v48, 16 }
 0x322   : > { %v1066_v63 = vpop.xlane.xlu0 %1065 }
 0x323   : > { %v1067_v38 = vcvt.f32.s32 %v1066_v63  ;;  %vm1276_vm6 = vcmp.eq.s32.totalorder %v2819_v26, %v1260_v56  ;;  %1331 = vperm.xlu1 %1840, %v1307_v6   ;;  %v1125_v63 = vshll.u32 %v1124_v17, 16  ;;  %v2897_v6 = vsel %vm1230_vm12, 1, %v2089_v1 }
 0x324   : > { %v1080_v51 = vpop.xlane.xlu1 %1079  ;;  %v1292_v22 = vsel %vm1276_vm6, 1, %v2089_v1 }
 0x325   : > { %v2825_v14 = vadd.s32 %v1069_v2, %v1067_v38  ;;  %v1081_v4 = vcvt.f32.s32 %v1080_v51  ;;  %v1308_v5 = vmul.u32 %v1292_v22, %v2849_v37  ;;  %v1167_v38 = vshll.u32 %v1166_v58, 16  ;;  %v1263_v2 = vld [vmem:[%s3211_s4 + $0x30] sm:$0xff] }
 0x326   : > { %v2876_v51 = vshll.u32 %v1180_v25, 16  ;;  %v1222_v22 = vcvt.f32.s32 %v2713_v27  ;;  %v1270_v27 = vld [vmem:[%s3211_s4 + $0x68] sm:$0xff] }
 0x327   : > { %vm1277_vm8 = vcmp.eq.s32.totalorder %v2825_v14, %v1261_v0  ;;  %v2840_v54 = vadd.s32 %v1083_v43, %v1081_v4  ;;  %1334 = vperm.xlu1 %1840, %v1308_v5   ;;  %v1264_v0 = vld [vmem:[%s3211_s4 + $0x38] sm:$0xff]  ;;  %v2920_v5 = vsel %vm1236_vm0, 1, %v2089_v1  ;;  %vm1323_vm0 = vcmp.eq.s32.totalorder %v2377_v36, 2 }
 0x328   : > { %v1293_v40 = vsel %vm1277_vm8, 1, %v2089_v1  ;;  %vm1240_vm8 = vcmp.gt.f32.partialorder %v2777_v3, 0.945 }
 0x329   : > { %vm1278_vm10 = vcmp.eq.s32.totalorder %v2840_v54, %v1262_v12  ;;  %v1309_v53 = vmul.u32 %v1293_v40, %v2869_v59  ;;  %v1265_v12 = vld [vmem:[%s3211_s4 + $0x40] sm:$0xff]  ;;  %v2975_v3 = vsel %vm1240_vm8, 1, %v2089_v1 }
 0x32a   : > { %v1094_v34 = vpop.xlane.xlu0 %1093  ;;  %v1294_v16 = vsel %vm1278_vm10, 1, %v2089_v1 }
 0x32b   : > { %v1095_v23 = vcvt.f32.s32 %v1094_v34  ;;  %v1194_v34 = vcvt.f32.s32 %v2704_v52  ;;  %1337 = vperm.xlu1 %1840, %v1309_v53   ;;  %v1268_v52 = vld [vmem:[%s3211_s4 + $0x58] sm:$0xff]  ;;  %v2949_v53 = vsel %vm1238_vm4, 1, %v2089_v1 }
 0x32c   : > { %v1108_v9 = vpop.xlane.xlu1 %1107 }
 0x32d   : > { %v2858_v33 = vadd.s32 %v1097_v21, %v1095_v23  ;;  %v1109_v31 = vcvt.f32.s32 %v1108_v9  ;;  %v1310_v9 = vmul.u32 %v1294_v16, %v2897_v6 }
 0x32e   : > { %v1122_v24 = vpop.xlane.xlu0 %1121 }
 0x32f   : > { %v1123_v20 = vcvt.f32.s32 %v1122_v24  ;;  %vm1279_vm13 = vcmp.eq.s32.totalorder %v2858_v33, %v1263_v2  ;;  %v2886_v43 = vadd.s32 %v1111_v39, %v1109_v31  ;;  %v1195_v24 = vshll.u32 %v1194_v34, 16  ;;  %1340 = vperm.xlu1 %1840, %v1310_v9  }
 0x330   : > { %v1136_v35 = vpop.xlane.xlu1 %1135  ;;  %v1295_v58 = vsel %vm1279_vm13, 1, %v2089_v1  ;;  %v1208_v31 = vcvt.f32.s32 %v2706_v8  ;;  %vm1237_vm13 = vcmp.gt.f32.partialorder %v2763_v7, 0.945 }
 0x331   : > { %v1137_v55 = vcvt.f32.s32 %v1136_v35  ;;  %v2906_v23 = vadd.s32 %v1125_v63, %v1123_v20  ;;  %vm1280_vm1 = vcmp.eq.s32.totalorder %v2886_v43, %v1264_v0 }
 0x332   : > { %v1150_v56 = vpop.xlane.xlu0 %1149  ;;  %v1296_v60 = vsel %vm1280_vm1, 1, %v2089_v1  ;;  %vm1322_vm1 = vcmp.eq.s32.totalorder %v2377_v36, 1 }
 0x333   : > { %v2871_v50 = vadd.s32 %v1139_v46, %v1137_v55  ;;  %v1151_v21 = vcvt.f32.s32 %v1150_v56  ;;  %v2926_v46 = vsel %vm1231_vm15, 1, %v2089_v1  ;;  %v1223_v55 = vshll.u32 %v1222_v22, 16  ;;  %v1272_v56 = vld [vmem:[%s3211_s4 + $0x78] sm:$0xff] }
 0x334   : > { %v1164_v4 = vpop.xlane.xlu1 %1163  ;;  %v1311_v40 = vmul.u32 %v1295_v58, %v2926_v46  ;;  %vm1281_vm5 = vcmp.eq.s32.totalorder %v2906_v23, %v1265_v12  ;;  %v2999_v12 = vsel %vm1237_vm13, 1, %v2089_v1  ;;  %vm1239_vm15 = vcmp.gt.f32.partialorder %v2771_v45, 0.945 }
 0x335   : > { %vm1282_vm14 = vcmp.eq.s32.totalorder %v2871_v50, %v1266_v47  ;;  %v1165_v13 = vcvt.f32.s32 %v1164_v4  ;;  %v2942_v2 = vadd.s32 %v1153_v42, %v1151_v21  ;;  %v2955_v42 = vsel %vm1232_vm3, 1, %v2089_v1 }
 0x336   : > { %v1298_v10 = vsel %vm1282_vm14, 1, %v2089_v1  ;;  %v1178_v17 = vpop.xlane.xlu0 %1177  ;;  %1343 = vperm.xlu1 %1840, %v1311_v40   ;;  %v1312_v16 = vmul.u32 %v1296_v60, %v2955_v42  ;;  %v1297_v0 = vsel %vm1281_vm5, 1, %v2089_v1 }
 0x337   : > { %v2900_v11 = vadd.s32 %v1167_v38, %v1165_v13  ;;  %v1314_v28 = vmul.u32 %v1298_v10, %v2893_v29  ;;  %v1267_v38 = vld [vmem:[%s3211_s4 + $0x50] sm:$0xff]  ;;  %v1179_v47 = vcvt.f32.s32 %v1178_v17  ;;  %v2979_v10 = vsel %vm1233_vm7, 1, %v2089_v1 }
 0x338   : > { %v1192_v48 = vpop.xlane.xlu1 %1191  ;;  %vm1283_vm9 = vcmp.eq.s32.totalorder %v2942_v2, %v1267_v38  ;;  %v1313_v9 = vmul.u32 %v1297_v0, %v2979_v10  ;;  %v1271_v17 = vld [vmem:[%s3211_s4 + $0x70] sm:$0xff] }
 0x339   : > { %vm1284_vm2 = vcmp.eq.s32.totalorder %v2900_v11, %v1268_v52  ;;  %v1193_v61 = vcvt.f32.s32 %v1192_v48  ;;  %1352 = vperm.xlu0 %1839, %v1314_v28   ;;  %v2968_v62 = vadd.s32 %v2876_v51, %v1179_v47  ;;  %v1209_v28 = vshll.u32 %v1208_v31, 16 }
 0x33a   : > { %v1300_v39 = vsel %vm1284_vm2, 1, %v2089_v1  ;;  %v1206_v8 = vpop.xlane.xlu0 %1205  ;;  %1346 = vperm.xlu1 %1840, %v1312_v16   ;;  %v2992_v48 = vsel %vm1235_vm11, 1, %v2089_v1  ;;  %vm1321_vm2 = vcmp.eq.s32.totalorder %v2377_v36, 0 }
 0x33b   : > { %v2929_v25 = vadd.s32 %v1195_v24, %v1193_v61  ;;  %v1316_v35 = vmul.u32 %v1300_v39, %v2920_v5  ;;  %v1207_v13 = vcvt.f32.s32 %v1206_v8  ;;  %v1299_v24 = vsel %vm1283_vm9, 1, %v2089_v1 }
 0x33c   : > { %v1220_v63 = vpop.xlane.xlu1 %1219  ;;  %vm1285_vm12 = vcmp.eq.s32.totalorder %v2968_v62, %v1269_v19  ;;  %v1315_v58 = vmul.u32 %v1299_v24, %v2992_v48 }
 0x33d   : > { %vm1286_vm6 = vcmp.eq.s32.totalorder %v2929_v25, %v1270_v27  ;;  %v1221_v32 = vcvt.f32.s32 %v1220_v63  ;;  %1358 = vperm.xlu0 %1839, %v1316_v35   ;;  %v2986_v22 = vadd.s32 %v1209_v28, %v1207_v13  ;;  %v1301_v18 = vsel %vm1285_vm12, 1, %v2089_v1 }
 0x33e   : > { %v1302_v34 = vsel %vm1286_vm6, 1, %v2089_v1  ;;  %1349 = vperm.xlu1 %1840, %v1313_v9   ;;  %v1317_v21 = vmul.u32 %v1301_v18, %v2999_v12  ;;  %v3005_v27 = vsel %vm1239_vm15, 1, %v2089_v1 }
 0x33f   : > { %v2958_v20 = vadd.s32 %v1223_v55, %v1221_v32  ;;  %v1318_v4 = vmul.u32 %v1302_v34, %v2949_v53  ;;  %vm1287_vm14 = vcmp.eq.s32.totalorder %v2986_v22, %v1271_v17 }
 0x340   : > { %v1303_v61 = vsel %vm1287_vm14, 1, %v2089_v1 }
 0x341   : > { %vm1288_vm10 = vcmp.eq.s32.totalorder %v2958_v20, %v1272_v56  ;;  %1364 = vperm.xlu0 %1839, %v1318_v4   ;;  %v1319_v7 = vmul.u32 %v1303_v61, %v3005_v27 }
 0x342   : > { %v1304_v52 = vsel %vm1288_vm10, 1, %v2089_v1  ;;  %1355 = vperm.xlu1 %1840, %v1315_v58  }
 0x343   : > { %v1320_v51 = vmul.u32 %v1304_v52, %v2975_v3 }
 0x345   : > { %1370 = vperm.xlu0 %1839, %v1320_v51  }
 0x346   : > { %1361 = vperm.xlu1 %1840, %v1317_v21  }
 0x34a   : > { %1367 = vperm.xlu1 %1840, %v1319_v7  }
 0x39a   : > { %v1326_v39 = vpop.permute.xlu0 %1325 }
 0x39b   : > { %v1372_v35 = vsel %vm1323_vm0, %v1326_v39, 0 }
 0x39c   : > { %v1388_v45 = vsel %vm1322_vm1, %v2800_v57, %v1372_v35 }
 0x39d   : > { %v1404_v1 = vsel %vm1321_vm2, %v2787_v15, %v1388_v45 }
 0x39e   : > { %1420 = vst [vmem:[#allocation9] sm:$0xff] %v1404_v1  ;;  %v1329_v40 = vpop.permute.xlu1 %1328 }
 0x39f   : > { %v1373_v31 = vsel %vm1323_vm0, %v1329_v40, 0 }
 0x3a0   : > { %v1389_v55 = vsel %vm1322_vm1, %v2815_v49, %v1373_v31 }
 0x3a1   : > { %v1405_v63 = vsel %vm1321_vm2, %v2803_v30, %v1389_v55 }
 0x3a2   : > { %1421 = vst [vmem:[#allocation9 + $0x8] sm:$0xff] %v1405_v63  ;;  %v1332_v60 = vpop.permute.xlu1 %1331 }
 0x3a3   : > { %v1374_v57 = vsel %vm1323_vm0, %v1332_v60, 0 }
 0x3a4   : > { %v1390_v15 = vsel %vm1322_vm1, %v2831_v44, %v1374_v57 }
 0x3a5   : > { %v1406_v38 = vsel %vm1321_vm2, %v2805_v41, %v1390_v15 }
 0x3a6   : > { %1422 = vst [vmem:[#allocation9 + $0x10] sm:$0xff] %v1406_v38  ;;  %v1335_v47 = vpop.permute.xlu1 %1334 }
 0x3a7   : > { %v1375_v49 = vsel %vm1323_vm0, %v1335_v47, 0 }
 0x3a8   : > { %v1391_v30 = vsel %vm1322_vm1, %v2849_v37, %v1375_v49 }
 0x3a9   : > { %v1407_v32 = vsel %vm1321_vm2, %v2819_v26, %v1391_v30 }
 0x3aa   : > { %1423 = vst [vmem:[#allocation9 + $0x18] sm:$0xff] %v1407_v32  ;;  %v1338_v8 = vpop.permute.xlu1 %1337 }
 0x3ab   : > { %v1376_v44 = vsel %vm1323_vm0, %v1338_v8, 0 }
 0x3ac   : > { %v1392_v41 = vsel %vm1322_vm1, %v2869_v59, %v1376_v44 }
 0x3ad   : > { %v1408_v56 = vsel %vm1321_vm2, %v2825_v14, %v1392_v41 }
 0x3ae   : > { %1424 = vst [vmem:[#allocation9 + $0x20] sm:$0xff] %v1408_v56  ;;  %v1341_v34 = vpop.permute.xlu1 %1340 }
 0x3af   : > { %v1377_v4 = vsel %vm1323_vm0, %v1341_v34, 0 }
 0x3b0   : > { %v1393_v16 = vsel %vm1322_vm1, %v2897_v6, %v1377_v4 }
 0x3b1   : > { %v1409_v14 = vsel %vm1321_vm2, %v2840_v54, %v1393_v16 }
 0x3b2   : > { %1425 = vst [vmem:[#allocation9 + $0x28] sm:$0xff] %v1409_v14 }
 0x3b5   : > { %v1344_v13 = vpop.permute.xlu1 %1343 }
 0x3b6   : > { %v1378_v52 = vsel %vm1323_vm0, %v1344_v13, 0 }
 0x3b8   : > { %v1353_v37 = vpop.permute.xlu0 %1352 }
 0x3b9   : > { %v1381_v26 = vsel %vm1323_vm0, %v1353_v37, 0  ;;  %v1347_v51 = vpop.permute.xlu1 %1346 }
 0x3ba   : > { %v1397_v59 = vsel %vm1322_vm1, %v2893_v29, %v1381_v26  ;;  %v1394_v29 = vsel %vm1322_vm1, %v2926_v46, %v1378_v52  ;;  %v1379_v24 = vsel %vm1323_vm0, %v1347_v51, 0 }
 0x3bb   : > { %v1413_v0 = vsel %vm1321_vm2, %v2871_v50, %v1397_v59  ;;  %v1410_v50 = vsel %vm1321_vm2, %v2858_v33, %v1394_v29 }
 0x3bc   : > { %1429 = vst [vmem:[#allocation9 + $0x48] sm:$0xff] %v1413_v0  ;;  %v1359_v19 = vpop.permute.xlu0 %1358  ;;  %1426 = vst [vmem:[#allocation9 + $0x30] sm:$0xff] %v1410_v50 }
 0x3bd   : > { %v1383_v6 = vsel %vm1323_vm0, %v1359_v19, 0  ;;  %v1350_v58 = vpop.permute.xlu1 %1349 }
 0x3be   : > { %v1399_v54 = vsel %vm1322_vm1, %v2920_v5, %v1383_v6  ;;  %v1395_v5 = vsel %vm1322_vm1, %v2955_v42, %v1379_v24  ;;  %v1380_v21 = vsel %vm1323_vm0, %v1350_v58, 0 }
 0x3bf   : > { %v1415_v28 = vsel %vm1321_vm2, %v2900_v11, %v1399_v54  ;;  %v1411_v11 = vsel %vm1321_vm2, %v2886_v43, %v1395_v5 }
 0x3c0   : > { %1431 = vst [vmem:[#allocation9 + $0x58] sm:$0xff] %v1415_v28  ;;  %v1365_v9 = vpop.permute.xlu0 %1364  ;;  %1427 = vst [vmem:[#allocation9 + $0x38] sm:$0xff] %v1411_v11 }
 0x3c1   : > { %v1385_v46 = vsel %vm1323_vm0, %v1365_v9, 0  ;;  %v1356_v7 = vpop.permute.xlu1 %1355 }
 0x3c2   : > { %v1401_v33 = vsel %vm1322_vm1, %v2949_v53, %v1385_v46  ;;  %v1396_v53 = vsel %vm1322_vm1, %v2979_v10, %v1380_v21  ;;  %v1382_v39 = vsel %vm1323_vm0, %v1356_v7, 0 }
 0x3c3   : > { %v1417_v17 = vsel %vm1321_vm2, %v2929_v25, %v1401_v33  ;;  %v1412_v25 = vsel %vm1321_vm2, %v2906_v23, %v1396_v53  ;;  %v1398_v10 = vsel %vm1322_vm1, %v2992_v48, %v1382_v39 }
 0x3c4   : > { %1433 = vst [vmem:[#allocation9 + $0x68] sm:$0xff] %v1417_v17  ;;  %v1371_v18 = vpop.permute.xlu0 %1370  ;;  %1428 = vst [vmem:[#allocation9 + $0x40] sm:$0xff] %v1412_v25 }
 0x3c5   : > { %v1387_v42 = vsel %vm1323_vm0, %v1371_v18, 0  ;;  %v1362_v23 = vpop.permute.xlu1 %1361 }
 0x3c6   : > { %v1403_v43 = vsel %vm1322_vm1, %v2975_v3, %v1387_v42  ;;  %v1414_v3 = vsel %vm1321_vm2, %v2942_v2, %v1398_v10  ;;  %v1384_v35 = vsel %vm1323_vm0, %v1362_v23, 0 }
 0x3c7   : > { %v1419_v61 = vsel %vm1321_vm2, %v2958_v20, %v1403_v43  ;;  %1430 = vst [vmem:[#allocation9 + $0x50] sm:$0xff] %v1414_v3  ;;  %v1400_v20 = vsel %vm1322_vm1, %v2999_v12, %v1384_v35 }
 0x3c8   : > { %1435 = vst [vmem:[#allocation9 + $0x78] sm:$0xff] %v1419_v61  ;;  %v1416_v45 = vsel %vm1321_vm2, %v2968_v62, %v1400_v20 }
 0x3c9   : > { %1432 = vst [vmem:[#allocation9 + $0x60] sm:$0xff] %v1416_v45  ;;  %v1368_v1 = vpop.permute.xlu1 %1367 }
 0x3ca   : > { %v1386_v48 = vsel %vm1323_vm0, %v1368_v1, 0 }
 0x3cb   : > { %v1402_v2 = vsel %vm1322_vm1, %v3005_v27, %v1386_v48 }
 0x3cc   : > { %v1418_v40 = vsel %vm1321_vm2, %v2986_v22, %v1402_v2 }
 0x3cd   : > { %1434 = vst [vmem:[#allocation9 + $0x70] sm:$0xff] %v1418_v40 }
 0x3ce PF: > { %s3222_s27 = sadd.s32 4294967295, %s2079_s26   ;;  %s2090_s10 = smov [#allocation8]  }
 0x3cf   : > { %p3141_p4 = scmp.eq.s32.totalorder %s3222_s27, 3  ;;  %s1445_s11 = sshll.u32 %s2090_s10, 4  ;;  %s1446_s11 = int_to_ptr.vmem [resolvable:$true] %s1445_s11 }
 0x3d0   : > { %s1965_s24 = scalar_lea.vmem %s1446_s11, 2048  ;;  %p1972_p0 = scmp.lt.s32.totalorder %s1446_s11, %s1446_s11 }
 0x3d1   : > { %p1966_p8 = scmp.ne.s32.totalorder %s1446_s11, %s1965_s24  ;;  %p1973_p10 = scmp.lt.s32.totalorder %s1965_s24, %s1965_s24 }
 0x3d3   : > { %p1967_p2 = pnand %p1966_p8, %p3141_p4  ;;  %p1974_p5 = por %p1973_p10, %p1972_p0 }
 0x3d5   : > { %p1968_p3 = pneg %p1967_p2 }
 0x3d7   : > { %p1975_p6 = pnand %p1974_p5, %p1968_p3 }
 0x3d9   : > { %1978 = shalt.err (!%p1975_p6)
}
 0x3da   : > { %s1979_s13 = scalar_lea.hbm %s3212_s5, 2048 }
 0x3db   : > { %p1980_p11 = scmp.ne.s32.totalorder %s3212_s5, %s1979_s13  ;;  %p1985_p7 = scmp.lt.u32.totalorder %s1979_s13, %s3212_s5 }
 0x3dd   : > { %p1981_p13 = pnand %p1980_p11, %p3141_p4 }
 0x3df   : > { %p1982_p1 = pneg %p1981_p13 }
 0x3e1   : > { %p1987_p9 = pnand %p1985_p7, %p1982_p1 }
 0x3e3   : > { %1990 = shalt.err (!%p1987_p9)
}
 0x3e4   : > { %s2091_s20 = smov 128   ;;  %s2092_s29 = smov 8  }
 0x3e5   : > { %1721 = dma.vmem_to_hbm [thread:$0]  (%p3141_p4), %s1446_s11, 2048, %s3212_s5, [#allocation5], %s2091_s20, %s2091_s20, %s2092_s29  }
 0x3e6   : > { %s2093_s12 = smov [#allocation9]  }
 0x3e7   : > { %s1461_s18 = sshll.u32 %s2093_s12, 4  ;;  %s1462_s18 = int_to_ptr.vmem [resolvable:$true] %s1461_s18 }
 0x3e8   : > { %s1991_s27 = scalar_lea.vmem %s1462_s18, 2048  ;;  %p1998_p3 = scmp.lt.s32.totalorder %s1462_s18, %s1462_s18 }
 0x3e9   : > { %p1992_p12 = scmp.ne.s32.totalorder %s1462_s18, %s1991_s27  ;;  %p1999_p0 = scmp.lt.s32.totalorder %s1991_s27, %s1991_s27 }
 0x3eb   : > { %p1993_p8 = pnand %p1992_p12, %p3141_p4  ;;  %p2000_p10 = por %p1999_p0, %p1998_p3 }
 0x3ed   : > { %p1994_p2 = pneg %p1993_p8 }
 0x3ef   : > { %p2001_p5 = pnand %p2000_p10, %p1994_p2 }
 0x3f1   : > { %2004 = shalt.err (!%p2001_p5)
}
 0x3f2   : > { %s2005_s16 = scalar_lea.hbm %s3213_s6, 2048 }
 0x3f3   : > { %p2006_p6 = scmp.ne.s32.totalorder %s3213_s6, %s2005_s16  ;;  %p2011_p1 = scmp.lt.u32.totalorder %s2005_s16, %s3213_s6 }
 0x3f5   : > { %p2007_p11 = pnand %p2006_p6, %p3141_p4 }
 0x3f7   : > { %p2008_p13 = pneg %p2007_p11 }
 0x3f9   : > { %p2013_p7 = pnand %p2011_p1, %p2008_p13 }
 0x3fb   : > { %2016 = shalt.err (!%p2013_p7)
}
 0x3fc   : > { %1723 = dma.vmem_to_hbm [thread:$0]  (%p3141_p4), %s1462_s18, 2048, %s3213_s6, [#allocation10], %s2091_s20, %s2091_s20, %s2092_s29  }
 0x3fd   : > { %2050 = dma.done.wait (%p3141_p4), [#allocation5], 2048  }
 0x3fe   : > { %2052 = vsyncadd (%p3141_p4), [#allocation5], 4294965248 }
 0x3ff   : > { %2054 = dma.done.wait (%p3141_p4), [#allocation10], 2048  }
 0x400   : > { %2056 = vsyncadd (%p3141_p4), [#allocation10], 4294965248 }
 0x401 PF: > { %s25_s26 = sadd.s32 1, %s2079_s26   ;;  %s3224_s21 = smov %s2063_s22 }
 0x402   : > { %p22_p9 = scmp.ge.s32.totalorder %s25_s26, 6   ;;  %s3225_s22 = smov %s2067_s23 }
 0x403   : > { %s3226_s23 = smov %s2180_s9  ;;  %s3227_s24 = smov %s2075_s25 }
 0x404   : > { %s3228_s25 = smov %s3230_s28  ;;  %24 = sbr.rel (!%p22_p9) target bundleno = 8 (0x8), region = 111 }
 0x40b   :  { %1481 = vsyncpa [#allocation4], 1 }
 0x40c   :  { %1483 = vsyncpa [#allocation4 + $0x1], 1 }
 0x40d   :  { %1484 = vsyncpa [#allocation7], 1 }
 0x40e   :  { %1486 = vsyncpa [#allocation7 + $0x1], 1 }
 0x40f   :  { %1487 = vsyncpa [#allocation5], 1 }
 0x410   :  { %1489 = vsyncpa [#allocation5 + $0x1], 1 }
 0x411   :  { %1490 = vsyncpa [#allocation10], 1 }

</bundles_post_ra>
